<compile_context>
chip_gen: v5e
topology: v5e:2x2
jax: 0.10.0
libtpu: 0.0.40
codegen_flags: <defaults>
</compile_context>

<pallas_src>
import numpy as np

import jax
import jax.numpy as jnp
from jax import lax
from jax.experimental import pallas as pl
from jax.experimental.pallas import tpu as pltpu


# -----------------------------------------------------------------------------
# Fused Pallas kernel: whole forward pass, everything VMEM-resident, 8 matmuls
# -----------------------------------------------------------------------------
def _net_kernel(x_ref,
                m1_ref, b1_ref,
                m2_ref, b2_ref,
                m3_ref, b3_ref,
                m4_ref, b4_ref,
                m5d_ref, m5e_ref, b5_ref,
                m6d_ref, m6e_ref, b6_ref,
                out_ref):
    f32, bf16 = jnp.float32, jnp.bfloat16

    def layer(parts, m_refs, b_ref, act):
        # parts  : list of [N, Cin_i*HWin] bf16 activations (split-K halves of the input)
        # m_refs : matching list of [Cin_i*HWin, Cout*HWout] bf16 fused (conv x weight) matrices
        # b_ref  : [1, Cout*HWout] f32 bias (channel value repeated over spatial positions)
        acc = b_ref[...]                                              # broadcasts over N rows
        for xv, m_ref in zip(parts, m_refs):
            acc = acc + jnp.dot(xv, m_ref[...], preferred_element_type=f32)
        if act == "relu":
            return jnp.maximum(acc, 0.0).astype(bf16)                 # bf16 feed for next MXU op
        return jax.nn.sigmoid(acc)                                    # final layer stays f32

    x = x_ref[...].astype(bf16)                                       # [N, 3*256]
    a1  = layer([x],      [m1_ref],           b1_ref, "relu")         # [N, 4*64]   'conv_1'
    a2  = layer([a1],     [m2_ref],           b2_ref, "relu")         # [N, 8*16]   'conv_2'
    enc = layer([a2],     [m3_ref],           b3_ref, "relu")         # [N, 16*4]
    d1  = layer([enc],    [m4_ref],           b4_ref, "relu")         # [N, 8*16]
    # hook: cat((dec, enc 'conv_2'), dim=1) fused as split-K accumulation
    d2  = layer([d1, a2], [m5d_ref, m5e_ref], b5_ref, "relu")         # [N, 4*64]
    # hook: cat((dec, enc 'conv_1'), dim=1) fused as split-K accumulation
    d3  = layer([d2, a1], [m6d_ref, m6e_ref], b6_ref, "sigmoid")      # [N, 3*256]
    out_ref[...] = d3


# -----------------------------------------------------------------------------
# Host-side (one-time) preparation: fold spatial gather/scatter AND channel weights
# into one dense matrix per layer:  out_flat = x_flat @ M + bias
# -----------------------------------------------------------------------------
def _fused_conv_matrix(w, h, width, stride, pad):
    """nn.Conv2d weight [Cout, Cin, k, k] -> dense [Cin*H*W, Cout*OH*OW] matrix."""
    w = np.asarray(w, np.float32)
    co, ci, k, _ = w.shape
    oh = (h + 2 * pad - k) // stride + 1
    ow = (width + 2 * pad - k) // stride + 1
    m = np.zeros((ci, h * width, co, oh * ow), np.float32)
    for oy in range(oh):
        for ox in range(ow):
            for ky in range(k):
                for kx in range(k):
                    iy = stride * oy + ky - pad
                    ix = stride * ox + kx - pad
                    if 0 <= iy < h and 0 <= ix < width:
                        m[:, iy * width + ix, :, oy * ow + ox] += w[:, :, ky, kx].T
    return m.reshape(ci * h * width, co * oh * ow), (oh, ow)


def _fused_convt_matrix(w, h, width, stride, pad):
    """nn.ConvTranspose2d weight [Cin, Cout, k, k] -> dense [Cin*H*W, Cout*OH*OW] matrix."""
    w = np.asarray(w, np.float32)
    ci, co, k, _ = w.shape
    oh = (h - 1) * stride - 2 * pad + k
    ow = (width - 1) * stride - 2 * pad + k
    m = np.zeros((ci, h * width, co, oh * ow), np.float32)
    for iy in range(h):
        for ix in range(width):
            for ky in range(k):
                for kx in range(k):
                    oy = stride * iy + ky - pad
                    ox = stride * ix + kx - pad
                    if 0 <= oy < oh and 0 <= ox < ow:
                        m[:, iy * width + ix, :, oy * ow + ox] += w[:, :, ky, kx]
    return m.reshape(ci * h * width, co * oh * ow), (oh, ow)


def _bias_lane(b, hw_out):
    """Per-channel bias -> [1, Cout*HWout] row (channel value repeated over spatial)."""
    b = np.asarray(b, np.float32)
    return np.repeat(b, hw_out).reshape(1, b.shape[0] * hw_out)


def prepare_net(params, height, width):
    """One-time, batch-independent repack of the parameters for the fused kernel."""
    m1, s1 = _fused_conv_matrix(params["w1"], height, width, 3 and 3, 1) if False else _fused_conv_matrix(params["w1"], height, width, 2, 1)
    # (kept explicit below for clarity)
    m1, s1 = _fused_conv_matrix(params["w1"], height, width, 2, 1)        # 16x16 -> 8x8
    m2, s2 = _fused_conv_matrix(params["w2"], *s1, 2, 1)                  #  8x8  -> 4x4
    m3, s3 = _fused_conv_matrix(params["w3"], *s2, 2, 1)                  #  4x4  -> 2x2
    m4, s4 = _fused_convt_matrix(params["wd1"], *s3, 2, 1)                #  2x2  -> 4x4

    wd2 = np.asarray(params["wd2"], np.float32)                           # [16, 4, 4, 4]
    m5d, s5 = _fused_convt_matrix(wd2[:8], *s4, 2, 1)                     # decoder half of cat
    m5e, _ = _fused_convt_matrix(wd2[8:], *s4, 2, 1)                      # encoder ('conv_2') half

    wd3 = np.asarray(params["wd3"], np.float32)                           # [8, 3, 4, 4]
    m6d, s6 = _fused_convt_matrix(wd3[:4], *s5, 2, 1)                     # decoder half of cat
    m6e, _ = _fused_convt_matrix(wd3[4:], *s5, 2, 1)                      # encoder ('conv_1') half
    assert s6 == (height, width)

    bf16 = lambda a: jnp.asarray(a, jnp.bfloat16)   # bf16 MXU operands, f32 accumulation
    f32 = lambda a: jnp.asarray(a, jnp.float32)
    hw = lambda s: s[0] * s[1]
    return (
        bf16(m1), f32(_bias_lane(params["b1"], hw(s1))),
        bf16(m2), f32(_bias_lane(params["b2"], hw(s2))),
        bf16(m3), f32(_bias_lane(params["b3"], hw(s3))),
        bf16(m4), f32(_bias_lane(params["bd1"], hw(s4))),
        bf16(m5d), bf16(m5e), f32(_bias_lane(params["bd2"], hw(s5))),
        bf16(m6d), bf16(m6e), f32(_bias_lane(params["bd3"], hw(s6))),
    )


def net_forward(x_nchw, prep):
    n, c, h, w = x_nchw.shape
    x2 = x_nchw.reshape(n, c * h * w).astype(jnp.float32)         # [N, C*H*W], free reshape

    # Advisory cost hint so XLA can overlap this (overhead-bound) call with neighbors.
    mat_elems = sum(int(p.size) for p in prep if p.dtype.itemsize == 2)   # bf16 matrices
    flops = int(2 * n * mat_elems)
    bytes_accessed = int(x2.size * x2.dtype.itemsize
                         + sum(int(p.size) * p.dtype.itemsize for p in prep)
                         + n * 3 * h * w * 4)
    transcendentals = int(n * 3 * h * w)                          # final sigmoid

    vmem = pl.BlockSpec(memory_space=pltpu.MemorySpace.VMEM)
    out2 = pl.pallas_call(
        _net_kernel,
        out_shape=jax.ShapeDtypeStruct((n, 3 * h * w), jnp.float32),
        in_specs=[vmem] * (1 + len(prep)),
        out_specs=vmem,
        cost_estimate=pl.CostEstimate(flops=flops,
                                      transcendentals=transcendentals,
                                      bytes_accessed=bytes_accessed),
    )(x2, *prep)
    return out2.reshape(n, 3, h, w)                               # free reshape back to NCHW


# -----------------------------------------------------------------------------
# Deterministic parameter init (PyTorch default-style uniform) and pure-JAX reference
# -----------------------------------------------------------------------------
def init_params(key):
    def uinit(k, shape, fan_in):
        bound = 1.0 / jnp.sqrt(jnp.float32(fan_in))
        return jax.random.uniform(k, shape, jnp.float32, -bound, bound)

    ks = jax.random.split(key, 12)
    p = {}
    # encoder: Conv2d weights [Cout, Cin, k, k]
    p["w1"], p["b1"] = uinit(ks[0], (4, 3, 3, 3), 3 * 9), uinit(ks[1], (4,), 3 * 9)
    p["w2"], p["b2"] = uinit(ks[2], (8, 4, 3, 3), 4 * 9), uinit(ks[3], (8,), 4 * 9)
    p["w3"], p["b3"] = uinit(ks[4], (16, 8, 3, 3), 8 * 9), uinit(ks[5], (16,), 8 * 9)
    # decoder: ConvTranspose2d weights [Cin, Cout, k, k]
    p["wd1"], p["bd1"] = uinit(ks[6], (16, 8, 4, 4), 8 * 16), uinit(ks[7], (8,), 8 * 16)
    p["wd2"], p["bd2"] = uinit(ks[8], (16, 4, 4, 4), 4 * 16), uinit(ks[9], (4,), 4 * 16)
    p["wd3"], p["bd3"] = uinit(ks[10], (8, 3, 4, 4), 3 * 16), uinit(ks[11], (3,), 3 * 16)
    return p


def _ref_forward(x, p):
    """Pure-JAX (XLA) f32 reference with PyTorch conv/convT semantics, NCHW."""
    def conv(v, w, b, s, pad):
        out = lax.conv_general_dilated(
            v, w, (s, s), [(pad, pad), (pad, pad)],
            dimension_numbers=("NCHW", "OIHW", "NCHW"),
            precision=lax.Precision.HIGHEST)
        return out + b.reshape(1, -1, 1, 1)

    def convt(v, w, b, s, pad):
        k = w.shape[2]
        wk = jnp.flip(jnp.transpose(w, (1, 0, 2, 3)), axis=(2, 3))
        out = lax.conv_general_dilated(
            v, wk, (1, 1), [(k - 1 - pad, k - 1 - pad)] * 2,
            lhs_dilation=(s, s),
            dimension_numbers=("NCHW", "OIHW", "NCHW"),
            precision=lax.Precision.HIGHEST)
        return out + b.reshape(1, -1, 1, 1)

    relu = lambda v: jnp.maximum(v, 0.0)
    a1 = relu(conv(x, p["w1"], p["b1"], 2, 1))
    a2 = relu(conv(a1, p["w2"], p["b2"], 2, 1))
    enc = relu(conv(a2, p["w3"], p["b3"], 2, 1))
    d1 = relu(convt(enc, p["wd1"], p["bd1"], 2, 1))
    d1 = jnp.concatenate([d1, a2], axis=1)
    d2 = relu(convt(d1, p["wd2"], p["bd2"], 2, 1))
    d2 = jnp.concatenate([d2, a1], axis=1)
    return jax.nn.sigmoid(convt(d2, p["wd3"], p["bd3"], 2, 1))


if __name__ == "__main__":
    key = jax.random.PRNGKey(0)
    pkey, xkey = jax.random.split(key)
    params = init_params(pkey)
    x = jax.random.normal(xkey, (2, 3, 16, 16), jnp.float32)      # NCHW, as PyTorch expects

    prep = prepare_net(params, height=16, width=16)               # one-time host-side repack
    fwd = jax.jit(net_forward)
    y = jax.block_until_ready(fwd(x, prep))

    assert y.shape == (2, 3, 16, 16), y.shape
    assert bool(jnp.all(jnp.isfinite(y)))
    assert bool(jnp.all(y >= 0.0)) and bool(jnp.all(y <= 1.0))    # sigmoid output range

    # Correctness vs a pure-f32 XLA reference of the PyTorch module.
    # bf16 MXU operands with f32 accumulation: expected abs error post-sigmoid ~1e-3.
    y_ref = _ref_forward(x, params)
    max_err = float(jnp.max(jnp.abs(y - y_ref)))
    assert max_err < 1e-2, max_err

    print("KERNEL_OK")
</pallas_src>

<mosaic_0001>
module attributes {stable_mosaic.version = 11 : i64} {
  func.func @_net_kernel(%arg0: memref<2x768xf32, #tpu.memory_space<vmem>>, %arg1: memref<768x256xbf16, #tpu.memory_space<vmem>>, %arg2: memref<1x256xf32, #tpu.memory_space<vmem>>, %arg3: memref<256x128xbf16, #tpu.memory_space<vmem>>, %arg4: memref<1x128xf32, #tpu.memory_space<vmem>>, %arg5: memref<128x64xbf16, #tpu.memory_space<vmem>>, %arg6: memref<1x64xf32, #tpu.memory_space<vmem>>, %arg7: memref<64x128xbf16, #tpu.memory_space<vmem>>, %arg8: memref<1x128xf32, #tpu.memory_space<vmem>>, %arg9: memref<128x256xbf16, #tpu.memory_space<vmem>>, %arg10: memref<128x256xbf16, #tpu.memory_space<vmem>>, %arg11: memref<1x256xf32, #tpu.memory_space<vmem>>, %arg12: memref<256x768xbf16, #tpu.memory_space<vmem>>, %arg13: memref<256x768xbf16, #tpu.memory_space<vmem>>, %arg14: memref<1x768xf32, #tpu.memory_space<vmem>>, %arg15: memref<2x768xf32, #tpu.memory_space<vmem>>) attributes {dimension_semantics = [], scalar_prefetch = 0 : i64, scratch_operands = 0 : i64, tpu.core_type = #tpu.core_type<tc>} {
    %c0 = arith.constant 0 : index
    %c0_0 = arith.constant 0 : index
    %0 = vector.load %arg0[%c0, %c0_0] : memref<2x768xf32, #tpu.memory_space<vmem>>, vector<2x768xf32>
    %1 = arith.truncf %0 : vector<2x768xf32> to vector<2x768xbf16>
    %c0_1 = arith.constant 0 : index
    %c0_2 = arith.constant 0 : index
    %2 = vector.load %arg2[%c0_1, %c0_2] : memref<1x256xf32, #tpu.memory_space<vmem>>, vector<1x256xf32>
    %c0_3 = arith.constant 0 : index
    %c0_4 = arith.constant 0 : index
    %3 = vector.load %arg1[%c0_3, %c0_4] : memref<768x256xbf16, #tpu.memory_space<vmem>>, vector<768x256xbf16>
    %cst = arith.constant dense<0.000000e+00> : vector<2x256xf32>
    %4 = tpu.matmul %1, %3, %cst {dimension_numbers = #tpu.dot_dimension_numbers<[1], [0], [0], [1], [0, 0, 1, 1], [], []>} : vector<2x768xbf16>, vector<768x256xbf16>, vector<2x256xf32> -> vector<2x256xf32>
    %5 = vector.broadcast %2 : vector<1x256xf32> to vector<2x256xf32>
    %6 = arith.addf %5, %4 : vector<2x256xf32>
    %cst_5 = arith.constant 0.000000e+00 : f32
    %7 = vector.broadcast %cst_5 : f32 to vector<2x256xf32>
    %8 = arith.maximumf %6, %7 : vector<2x256xf32>
    %9 = arith.truncf %8 : vector<2x256xf32> to vector<2x256xbf16>
    %c0_6 = arith.constant 0 : index
    %c0_7 = arith.constant 0 : index
    %10 = vector.load %arg4[%c0_6, %c0_7] : memref<1x128xf32, #tpu.memory_space<vmem>>, vector<1x128xf32>
    %c0_8 = arith.constant 0 : index
    %c0_9 = arith.constant 0 : index
    %11 = vector.load %arg3[%c0_8, %c0_9] : memref<256x128xbf16, #tpu.memory_space<vmem>>, vector<256x128xbf16>
    %cst_10 = arith.constant dense<0.000000e+00> : vector<2x128xf32>
    %12 = tpu.matmul %9, %11, %cst_10 {dimension_numbers = #tpu.dot_dimension_numbers<[1], [0], [0], [1], [0, 0, 1, 1], [], []>} : vector<2x256xbf16>, vector<256x128xbf16>, vector<2x128xf32> -> vector<2x128xf32>
    %13 = vector.broadcast %10 : vector<1x128xf32> to vector<2x128xf32>
    %14 = arith.addf %13, %12 : vector<2x128xf32>
    %cst_11 = arith.constant 0.000000e+00 : f32
    %15 = vector.broadcast %cst_11 : f32 to vector<2x128xf32>
    %16 = arith.maximumf %14, %15 : vector<2x128xf32>
    %17 = arith.truncf %16 : vector<2x128xf32> to vector<2x128xbf16>
    %c0_12 = arith.constant 0 : index
    %c0_13 = arith.constant 0 : index
    %18 = vector.load %arg6[%c0_12, %c0_13] : memref<1x64xf32, #tpu.memory_space<vmem>>, vector<1x64xf32>
    %c0_14 = arith.constant 0 : index
    %c0_15 = arith.constant 0 : index
    %19 = vector.load %arg5[%c0_14, %c0_15] : memref<128x64xbf16, #tpu.memory_space<vmem>>, vector<128x64xbf16>
    %cst_16 = arith.constant dense<0.000000e+00> : vector<2x64xf32>
    %20 = tpu.matmul %17, %19, %cst_16 {dimension_numbers = #tpu.dot_dimension_numbers<[1], [0], [0], [1], [0, 0, 1, 1], [], []>} : vector<2x128xbf16>, vector<128x64xbf16>, vector<2x64xf32> -> vector<2x64xf32>
    %21 = vector.broadcast %18 : vector<1x64xf32> to vector<2x64xf32>
    %22 = arith.addf %21, %20 : vector<2x64xf32>
    %cst_17 = arith.constant 0.000000e+00 : f32
    %23 = vector.broadcast %cst_17 : f32 to vector<2x64xf32>
    %24 = arith.maximumf %22, %23 : vector<2x64xf32>
    %25 = arith.truncf %24 : vector<2x64xf32> to vector<2x64xbf16>
    %c0_18 = arith.constant 0 : index
    %c0_19 = arith.constant 0 : index
    %26 = vector.load %arg8[%c0_18, %c0_19] : memref<1x128xf32, #tpu.memory_space<vmem>>, vector<1x128xf32>
    %c0_20 = arith.constant 0 : index
    %c0_21 = arith.constant 0 : index
    %27 = vector.load %arg7[%c0_20, %c0_21] : memref<64x128xbf16, #tpu.memory_space<vmem>>, vector<64x128xbf16>
    %cst_22 = arith.constant dense<0.000000e+00> : vector<2x128xf32>
    %28 = tpu.matmul %25, %27, %cst_22 {dimension_numbers = #tpu.dot_dimension_numbers<[1], [0], [0], [1], [0, 0, 1, 1], [], []>} : vector<2x64xbf16>, vector<64x128xbf16>, vector<2x128xf32> -> vector<2x128xf32>
    %29 = vector.broadcast %26 : vector<1x128xf32> to vector<2x128xf32>
    %30 = arith.addf %29, %28 : vector<2x128xf32>
    %cst_23 = arith.constant 0.000000e+00 : f32
    %31 = vector.broadcast %cst_23 : f32 to vector<2x128xf32>
    %32 = arith.maximumf %30, %31 : vector<2x128xf32>
    %33 = arith.truncf %32 : vector<2x128xf32> to vector<2x128xbf16>
    %c0_24 = arith.constant 0 : index
    %c0_25 = arith.constant 0 : index
    %34 = vector.load %arg11[%c0_24, %c0_25] : memref<1x256xf32, #tpu.memory_space<vmem>>, vector<1x256xf32>
    %c0_26 = arith.constant 0 : index
    %c0_27 = arith.constant 0 : index
    %35 = vector.load %arg9[%c0_26, %c0_27] : memref<128x256xbf16, #tpu.memory_space<vmem>>, vector<128x256xbf16>
    %cst_28 = arith.constant dense<0.000000e+00> : vector<2x256xf32>
    %36 = tpu.matmul %33, %35, %cst_28 {dimension_numbers = #tpu.dot_dimension_numbers<[1], [0], [0], [1], [0, 0, 1, 1], [], []>} : vector<2x128xbf16>, vector<128x256xbf16>, vector<2x256xf32> -> vector<2x256xf32>
    %37 = vector.broadcast %34 : vector<1x256xf32> to vector<2x256xf32>
    %38 = arith.addf %37, %36 : vector<2x256xf32>
    %c0_29 = arith.constant 0 : index
    %c0_30 = arith.constant 0 : index
    %39 = vector.load %arg10[%c0_29, %c0_30] : memref<128x256xbf16, #tpu.memory_space<vmem>>, vector<128x256xbf16>
    %cst_31 = arith.constant dense<0.000000e+00> : vector<2x256xf32>
    %40 = tpu.matmul %17, %39, %cst_31 {dimension_numbers = #tpu.dot_dimension_numbers<[1], [0], [0], [1], [0, 0, 1, 1], [], []>} : vector<2x128xbf16>, vector<128x256xbf16>, vector<2x256xf32> -> vector<2x256xf32>
    %41 = arith.addf %38, %40 : vector<2x256xf32>
    %cst_32 = arith.constant 0.000000e+00 : f32
    %42 = vector.broadcast %cst_32 : f32 to vector<2x256xf32>
    %43 = arith.maximumf %41, %42 : vector<2x256xf32>
    %44 = arith.truncf %43 : vector<2x256xf32> to vector<2x256xbf16>
    %c0_33 = arith.constant 0 : index
    %c0_34 = arith.constant 0 : index
    %45 = vector.load %arg14[%c0_33, %c0_34] : memref<1x768xf32, #tpu.memory_space<vmem>>, vector<1x768xf32>
    %c0_35 = arith.constant 0 : index
    %c0_36 = arith.constant 0 : index
    %46 = vector.load %arg12[%c0_35, %c0_36] : memref<256x768xbf16, #tpu.memory_space<vmem>>, vector<256x768xbf16>
    %cst_37 = arith.constant dense<0.000000e+00> : vector<2x768xf32>
    %47 = tpu.matmul %44, %46, %cst_37 {dimension_numbers = #tpu.dot_dimension_numbers<[1], [0], [0], [1], [0, 0, 1, 1], [], []>} : vector<2x256xbf16>, vector<256x768xbf16>, vector<2x768xf32> -> vector<2x768xf32>
    %48 = vector.broadcast %45 : vector<1x768xf32> to vector<2x768xf32>
    %49 = arith.addf %48, %47 : vector<2x768xf32>
    %c0_38 = arith.constant 0 : index
    %c0_39 = arith.constant 0 : index
    %50 = vector.load %arg13[%c0_38, %c0_39] : memref<256x768xbf16, #tpu.memory_space<vmem>>, vector<256x768xbf16>
    %cst_40 = arith.constant dense<0.000000e+00> : vector<2x768xf32>
    %51 = tpu.matmul %9, %50, %cst_40 {dimension_numbers = #tpu.dot_dimension_numbers<[1], [0], [0], [1], [0, 0, 1, 1], [], []>} : vector<2x256xbf16>, vector<256x768xbf16>, vector<2x768xf32> -> vector<2x768xf32>
    %52 = arith.addf %49, %51 : vector<2x768xf32>
    %53 = arith.negf %52 : vector<2x768xf32>
    %54 = math.exp %53 : vector<2x768xf32>
    %cst_41 = arith.constant 1.000000e+00 : f32
    %55 = vector.broadcast %cst_41 : f32 to vector<2x768xf32>
    %56 = arith.addf %55, %54 : vector<2x768xf32>
    %57 = arith.divf %55, %56 : vector<2x768xf32>
    %c0_42 = arith.constant 0 : index
    %c0_43 = arith.constant 0 : index
    %58 = vector.load %arg15[%c0_42, %c0_43] : memref<2x768xf32, #tpu.memory_space<vmem>>, vector<2x768xf32>
    tpu.vector_store %arg15[%c0_42, %c0_43], %57 {strides = array<i32>} : memref<2x768xf32, #tpu.memory_space<vmem>>, vector<2x768xf32>,
    return
  }
}

</mosaic_0001>

<bundles_post_ra>
// kernel: net_forward.1
= control target key start
LH: loop header
LB: loop body
LE: loop exit
PB: predicated region body
PF: predicated region fallthrough
CT: control target
= control target key end

     0   :  { %s5314_s0 = inlined_call_operand.vmem [shape: f32[2,768], index: 0, kind: input, shape index: {}]   ;;  %s5315_s1 = inlined_call_operand.hbm [shape: bf16[768,256], index: 1, kind: input, shape index: {}]   ;;  %s5316_s2 = inlined_call_operand.vmem [shape: f32[1,256], index: 2, kind: input, shape index: {}]   ;;  %s5317_s3 = inlined_call_operand.vmem [shape: bf16[256,128], index: 3, kind: input, shape index: {}]   ;;  %s5318_s4 = inlined_call_operand.vmem [shape: f32[1,128], index: 4, kind: input, shape index: {}]   ;;  %s5319_s5 = inlined_call_operand.vmem [shape: bf16[128,64], index: 5, kind: input, shape index: {}]   ;;  %s5320_s6 = inlined_call_operand.vmem [shape: f32[1,64], index: 6, kind: input, shape index: {}]   ;;  %s5321_s7 = inlined_call_operand.vmem [shape: bf16[64,128], index: 7, kind: input, shape index: {}]   ;;  %s5322_s8 = inlined_call_operand.vmem [shape: f32[1,128], index: 8, kind: input, shape index: {}]   ;;  %s5323_s9 = inlined_call_operand.hbm [shape: bf16[128,256], index: 9, kind: input, shape index: {}]   ;;  %s5324_s10 = inlined_call_operand.hbm [shape: bf16[128,256], index: 10, kind: input, shape index: {}]   ;;  %s5325_s11 = inlined_call_operand.vmem [shape: f32[1,256], index: 11, kind: input, shape index: {}]   ;;  %s5326_s12 = inlined_call_operand.hbm [shape: bf16[256,768], index: 12, kind: input, shape index: {}]   ;;  %s5327_s13 = inlined_call_operand.hbm [shape: bf16[256,768], index: 13, kind: input, shape index: {}]   ;;  %s5328_s14 = inlined_call_operand.vmem [shape: f32[1,768], index: 14, kind: input, shape index: {}]   ;;  %s5329_s15 = inlined_call_operand.vmem [shape: f32[2,768], index: 15, kind: output, shape index: {}]  }
   0x1   :  { %5331 = sst [smem:[#allocation13_spill]] %s5329_s15 }
   0x2   :  { %20 = vsyncpa [#allocation3], 0 }
   0x3   :  { %21 = vsyncpa [#allocation5], 0 }
   0x4   :  { %22 = vsyncpa [#allocation8], 0  ;;  %s56_s20 = sshll.u32 %s5323_s9, 4  ;;  %s4998_s21 = smov [#allocation4]   ;;  %s57_s20 = int_to_ptr.hbm [resolvable:$true] %s56_s20 }
   0x5   :  { %s58_s22 = sshll.u32 %s4998_s21, 4  ;;  %s84_s25 = sshll.u32 %s5326_s12, 4  ;;  %s59_s22 = int_to_ptr.vmem [resolvable:$true] %s58_s22  ;;  %s85_s25 = int_to_ptr.hbm [resolvable:$true] %s84_s25 }
   0x6   :  { %s4999_s26 = smov 128   ;;  %s5000_s27 = smov 8  }
   0x7   :  { %64 = dma.hbm_to_vmem [thread:$0]  %s57_s20, 2048, %s59_s22, [#allocation5], %s4999_s26, %s4999_s26, %s5000_s27  }
   0x8   :  { %s5001_s28 = smov [#allocation7]   ;;  %s5002_s30 = smov 384  }
   0x9   :  { %s86_s29 = sshll.u32 %s5001_s28, 4  ;;  %s5003_s16 = smov 24   ;;  %s87_s29 = int_to_ptr.vmem [resolvable:$true] %s86_s29 }
   0xa   :  { %92 = dma.hbm_to_vmem [thread:$0]  %s85_s25, 12288, %s87_s29, [#allocation8], %s5002_s30, %s5002_s30, %s5003_s16  }
   0xb   :  { %s29_s18 = sshll.u32 %s5315_s1, 4  ;;  %s5004_s19 = smov [#allocation2]   ;;  %s30_s18 = int_to_ptr.hbm [resolvable:$true] %s29_s18 }
   0xc   :  { %s31_s21 = sshll.u32 %s5004_s19, 4  ;;  %s69_s24 = sshll.u32 %s5324_s10, 4  ;;  %s32_s21 = int_to_ptr.vmem [resolvable:$true] %s31_s21  ;;  %s70_s24 = int_to_ptr.hbm [resolvable:$true] %s69_s24 }
   0xd   :  { %37 = dma.hbm_to_vmem [thread:$0]  %s30_s18, 12288, %s32_s21, [#allocation3], %s4999_s26, %s4999_s26, %s5000_s27  }
   0xe   :  { %s5005_s20 = smov [#allocation6]   ;;  %s97_s25 = sshll.u32 %s5327_s13, 4  ;;  %s98_s25 = int_to_ptr.hbm [resolvable:$true] %s97_s25 }
   0xf   :  { %s71_s22 = sshll.u32 %s5005_s20, 4  ;;  %s5006_s1 = smov [#allocation9]   ;;  %s72_s22 = int_to_ptr.vmem [resolvable:$true] %s71_s22 }
  0x10   :  { %77 = dma.hbm_to_vmem [thread:$0]  %s70_s24, 2048, %s72_s22, [#allocation5], %s4999_s26, %s4999_s26, %s5000_s27  }
  0x11   :  { %s99_s29 = sshll.u32 %s5006_s1, 4  ;;  %s100_s29 = int_to_ptr.vmem [resolvable:$true] %s99_s29 }
  0x12   :  { %105 = dma.hbm_to_vmem [thread:$0]  %s98_s25, 12288, %s100_s29, [#allocation8], %s5002_s30, %s5002_s30, %s5003_s16  }
  0x13   :  { %4992 = dma.done.wait [#allocation3], 12288  }
  0x14   :  { %4993 = vsyncadd [#allocation3], 4294955008 }
  0x15   :  { %4994 = dma.done.wait [#allocation5], 4096  }
  0x16   :  { %4995 = vsyncadd [#allocation5], 4294963200 }
  0x17   :  { %4996 = dma.done.wait [#allocation8], 24576  }
  0x18   :  { %4997 = vsyncadd [#allocation8], 4294942720  ;;  %v3147_v0 = vld [vmem:[#allocation2 + $0x70] sm:$0xf]  ;;  %v4503_v1 = vld [vmem:[#allocation2 + $0x74] sm:$0xf0] }
  0x19   :  { %v3211_v2 = vld [vmem:[#allocation2 + $0xf0] sm:$0xf]  ;;  %v3148_v3 = vor.u32 %v4503_v1, %v3147_v0  ;;  %v4519_v4 = vld [vmem:[#allocation2 + $0xf4] sm:$0xf0]  ;;  %v3139_v11 = vld [vmem:[#allocation2 + $0x60] sm:$0xf] }
  0x1a   :  { %v3275_v5 = vld [vmem:[#allocation2 + $0x170] sm:$0xf]  ;;  %v4535_v6 = vld [vmem:[#allocation2 + $0x174] sm:$0xf0]  ;;  %v3212_v7 = vor.u32 %v4519_v4, %v3211_v2  ;;  %v4501_v13 = vld [vmem:[#allocation2 + $0x64] sm:$0xf0] }
  0x1b   :  { %v3276_v8 = vor.u32 %v4535_v6, %v3275_v5  ;;  %v3339_v9 = vld [vmem:[#allocation2 + $0x1f0] sm:$0xf]  ;;  %v4551_v10 = vld [vmem:[#allocation2 + $0x1f4] sm:$0xf0]  ;;  %731 = vmatpush.bf16.msra.mxu0 %v3148_v3  ;;  %v3203_v14 = vld [vmem:[#allocation2 + $0xe0] sm:$0xf]  ;;  %v3140_v16 = vor.u32 %v4501_v13, %v3139_v11 }
  0x1c   :  { %v3340_v12 = vor.u32 %v4551_v10, %v3339_v9  ;;  %v4517_v15 = vld [vmem:[#allocation2 + $0xe4] sm:$0xf0]  ;;  %744 = vmatpush.bf16.msra.mxu1 %v3212_v7  ;;  %v3267_v18 = vld [vmem:[#allocation2 + $0x160] sm:$0xf]  ;;  %v3131_v23 = vld [vmem:[#allocation2 + $0x50] sm:$0xf] }
  0x1d   :  { %757 = vmatpush.bf16.msra.mxu2 %v3276_v8  ;;  %v3204_v17 = vor.u32 %v4517_v15, %v3203_v14  ;;  %v4533_v19 = vld [vmem:[#allocation2 + $0x164] sm:$0xf0]  ;;  %v3331_v20 = vld [vmem:[#allocation2 + $0x1e0] sm:$0xf]  ;;  %v4499_v24 = vld [vmem:[#allocation2 + $0x54] sm:$0xf0] }
  0x1e   :  { %770 = vmatpush.bf16.msra.mxu3 %v3340_v12  ;;  %v3268_v21 = vor.u32 %v4533_v19, %v3267_v18  ;;  %v4549_v22 = vld [vmem:[#allocation2 + $0x1e4] sm:$0xf0]  ;;  %v3195_v26 = vld [vmem:[#allocation2 + $0xd0] sm:$0xf]  ;;  %v4515_v27 = vld [vmem:[#allocation2 + $0xd4] sm:$0xf0]  ;;  %v3132_v29 = vor.u32 %v4499_v24, %v3131_v23 }
  0x1f   :  { %v3332_v25 = vor.u32 %v4549_v22, %v3331_v20  ;;  %v3259_v28 = vld [vmem:[#allocation2 + $0x150] sm:$0xf]  ;;  %732 = vmatpush.bf16.msra.mxu0 %v3140_v16  ;;  %v4531_v30 = vld [vmem:[#allocation2 + $0x154] sm:$0xf0]  ;;  %v3196_v33 = vor.u32 %v4515_v27, %v3195_v26  ;;  %v3123_v35 = vld [vmem:[#allocation2 + $0x40] sm:$0xf] }
  0x20   :  { %v3323_v31 = vld [vmem:[#allocation2 + $0x1d0] sm:$0xf]  ;;  %v4547_v32 = vld [vmem:[#allocation2 + $0x1d4] sm:$0xf0]  ;;  %745 = vmatpush.bf16.msra.mxu1 %v3204_v17  ;;  %v3260_v34 = vor.u32 %v4531_v30, %v3259_v28  ;;  %v4497_v36 = vld [vmem:[#allocation2 + $0x44] sm:$0xf0] }
  0x21   :  { %758 = vmatpush.bf16.msra.mxu2 %v3268_v21  ;;  %v3187_v37 = vld [vmem:[#allocation2 + $0xc0] sm:$0xf]  ;;  %v3324_v38 = vor.u32 %v4547_v32, %v3323_v31  ;;  %v4513_v39 = vld [vmem:[#allocation2 + $0xc4] sm:$0xf0]  ;;  %v3124_v44 = vor.u32 %v4497_v36, %v3123_v35  ;;  %v3115_v47 = vld [vmem:[#allocation2 + $0x30] sm:$0xf] }
  0x22   :  { %771 = vmatpush.bf16.msra.mxu3 %v3332_v25  ;;  %v3251_v40 = vld [vmem:[#allocation2 + $0x140] sm:$0xf]  ;;  %v4529_v41 = vld [vmem:[#allocation2 + $0x144] sm:$0xf0]  ;;  %v3188_v45 = vor.u32 %v4513_v39, %v3187_v37  ;;  %v4495_v48 = vld [vmem:[#allocation2 + $0x34] sm:$0xf0] }
  0x23   :  { %v3315_v42 = vld [vmem:[#allocation2 + $0x1c0] sm:$0xf]  ;;  %v4545_v43 = vld [vmem:[#allocation2 + $0x1c4] sm:$0xf0]  ;;  %733 = vmatpush.bf16.msra.mxu0 %v3132_v29  ;;  %v3252_v46 = vor.u32 %v4529_v41, %v3251_v40  ;;  %v3179_v49 = vld [vmem:[#allocation2 + $0xb0] sm:$0xf]  ;;  %v3116_v56 = vor.u32 %v4495_v48, %v3115_v47 }
  0x24   :  { %746 = vmatpush.bf16.msra.mxu1 %v3196_v33  ;;  %v3316_v50 = vor.u32 %v4545_v43, %v3315_v42  ;;  %v4511_v51 = vld [vmem:[#allocation2 + $0xb4] sm:$0xf0]  ;;  %v3243_v52 = vld [vmem:[#allocation2 + $0x130] sm:$0xf]  ;;  %v3107_v59 = vld [vmem:[#allocation2 + $0x20] sm:$0xf] }
  0x25   :  { %759 = vmatpush.bf16.msra.mxu2 %v3260_v34  ;;  %v4527_v53 = vld [vmem:[#allocation2 + $0x134] sm:$0xf0]  ;;  %v3307_v54 = vld [vmem:[#allocation2 + $0x1b0] sm:$0xf]  ;;  %v3180_v57 = vor.u32 %v4511_v51, %v3179_v49  ;;  %v4493_v60 = vld [vmem:[#allocation2 + $0x24] sm:$0xf0] }
  0x26   :  { %772 = vmatpush.bf16.msra.mxu3 %v3324_v38  ;;  %v4543_v55 = vld [vmem:[#allocation2 + $0x1b4] sm:$0xf0]  ;;  %v3244_v58 = vor.u32 %v4527_v53, %v3243_v52  ;;  %v3171_v61 = vld [vmem:[#allocation2 + $0xa0] sm:$0xf]  ;;  %v4509_v63 = vld [vmem:[#allocation2 + $0xa4] sm:$0xf0]  ;;  %v3108_v4 = vor.u32 %v4493_v60, %v3107_v59 }
  0x27   :  { %734 = vmatpush.bf16.msra.mxu0 %v3124_v44  ;;  %v3308_v62 = vor.u32 %v4543_v55, %v3307_v54  ;;  %v3235_v0 = vld [vmem:[#allocation2 + $0x120] sm:$0xf]  ;;  %v4525_v1 = vld [vmem:[#allocation2 + $0x124] sm:$0xf0]  ;;  %v3172_v5 = vor.u32 %v4509_v63, %v3171_v61  ;;  %v3099_v7 = vld [vmem:[#allocation2 + $0x10] sm:$0xf] }
  0x28   :  { %747 = vmatpush.bf16.msra.mxu1 %v3188_v45  ;;  %v3299_v2 = vld [vmem:[#allocation2 + $0x1a0] sm:$0xf]  ;;  %v4541_v3 = vld [vmem:[#allocation2 + $0x1a4] sm:$0xf0]  ;;  %v3236_v6 = vor.u32 %v4525_v1, %v3235_v0  ;;  %v4491_v8 = vld [vmem:[#allocation2 + $0x14] sm:$0xf0] }
  0x29   :  { %760 = vmatpush.bf16.msra.mxu2 %v3252_v46  ;;  %v3163_v9 = vld [vmem:[#allocation2 + $0x90] sm:$0xf]  ;;  %v3300_v10 = vor.u32 %v4541_v3, %v3299_v2  ;;  %v4507_v11 = vld [vmem:[#allocation2 + $0x94] sm:$0xf0]  ;;  %v3100_v16 = vor.u32 %v4491_v8, %v3099_v7  ;;  %v3091_v17 = vld [vmem:[#allocation2] sm:$0xf] }
  0x2a   :  { %773 = vmatpush.bf16.msra.mxu3 %v3316_v50  ;;  %v3227_v12 = vld [vmem:[#allocation2 + $0x110] sm:$0xf]  ;;  %v4523_v13 = vld [vmem:[#allocation2 + $0x114] sm:$0xf0]  ;;  %v4489_v18 = vld [vmem:[#allocation2 + $0x4] sm:$0xf0]  ;;  %v3164_v19 = vor.u32 %v4507_v11, %v3163_v9 }
  0x2b   :  { %735 = vmatpush.bf16.msra.mxu0 %v3116_v56  ;;  %v3291_v14 = vld [vmem:[#allocation2 + $0x190] sm:$0xf]  ;;  %v4539_v15 = vld [vmem:[#allocation2 + $0x194] sm:$0xf0]  ;;  %v3228_v20 = vor.u32 %v4523_v13, %v3227_v12  ;;  %v3155_v21 = vld [vmem:[#allocation2 + $0x80] sm:$0xf]  ;;  %v3092_v31 = vor.u32 %v4489_v18, %v3091_v17 }
  0x2c   :  { %748 = vmatpush.bf16.msra.mxu1 %v3180_v57  ;;  %v4505_v22 = vld [vmem:[#allocation2 + $0x84] sm:$0xf0]  ;;  %v3219_v23 = vld [vmem:[#allocation2 + $0x100] sm:$0xf]  ;;  %v3292_v24 = vor.u32 %v4539_v15, %v3291_v14  ;;  %v3403_v28 = vld [vmem:[#allocation2 + $0x270] sm:$0xf] }
  0x2d   :  { %761 = vmatpush.bf16.msra.mxu2 %v3244_v58  ;;  %v4521_v25 = vld [vmem:[#allocation2 + $0x104] sm:$0xf0]  ;;  %v3283_v26 = vld [vmem:[#allocation2 + $0x180] sm:$0xf]  ;;  %v4567_v29 = vld [vmem:[#allocation2 + $0x274] sm:$0xf0]  ;;  %v3156_v35 = vor.u32 %v4505_v22, %v3155_v21 }
  0x2e   :  { %774 = vmatpush.bf16.msra.mxu3 %v3308_v62  ;;  %v4537_v27 = vld [vmem:[#allocation2 + $0x184] sm:$0xf0]  ;;  %v3467_v30 = vld [vmem:[#allocation2 + $0x2f0] sm:$0xf]  ;;  %v4583_v32 = vld [vmem:[#allocation2 + $0x2f4] sm:$0xf0]  ;;  %v3220_v36 = vor.u32 %v4521_v25, %v3219_v23  ;;  %v3404_v40 = vor.u32 %v4567_v29, %v3403_v28 }
  0x2f   :  { %736 = vmatpush.bf16.msra.mxu0 %v3108_v4  ;;  %v4502_v33 = vld [vmem:[#allocation2 + $0x74] sm:$0xf]  ;;  %v3149_v34 = vld [vmem:[#allocation2 + $0x78] sm:$0xf0]  ;;  %v3284_v39 = vor.u32 %v4537_v27, %v3283_v26  ;;  %v3468_v41 = vor.u32 %v4583_v32, %v3467_v30  ;;  %v3395_v43 = vld [vmem:[#allocation2 + $0x260] sm:$0xf] }
  0x30   :  { %749 = vmatpush.bf16.msra.mxu1 %v3172_v5  ;;  %v4518_v37 = vld [vmem:[#allocation2 + $0xf4] sm:$0xf]  ;;  %v3213_v38 = vld [vmem:[#allocation2 + $0xf8] sm:$0xf0]  ;;  %v3152_v42 = vor.u32 %v4502_v33, %v3149_v34  ;;  %v4565_v44 = vld [vmem:[#allocation2 + $0x264] sm:$0xf0] }
  0x31   :  { %762 = vmatpush.bf16.msra.mxu2 %v3236_v6  ;;  %v3459_v45 = vld [vmem:[#allocation2 + $0x2e0] sm:$0xf]  ;;  %v3216_v46 = vor.u32 %v4518_v37, %v3213_v38  ;;  %v4581_v47 = vld [vmem:[#allocation2 + $0x2e4] sm:$0xf0]  ;;  %v4500_v48 = vld [vmem:[#allocation2 + $0x64] sm:$0xf]  ;;  %v3396_v53 = vor.u32 %v4565_v44, %v3395_v43 }
  0x32   :  { %775 = vmatpush.bf16.msra.mxu3 %v3300_v10  ;;  %v3141_v49 = vld [vmem:[#allocation2 + $0x68] sm:$0xf0]  ;;  %v4516_v50 = vld [vmem:[#allocation2 + $0xe4] sm:$0xf]  ;;  %v129_v52 = vld [vmem:[%s5314_s0] sm:$0xff]  ;;  %v3460_v54 = vor.u32 %v4581_v47, %v3459_v45  ;;  %vm1176_vm0 = vcmask 523264  }
  0x33   :  { %737 = vmatpush.bf16.msra.mxu0 %v3100_v16  ;;  %v3205_v51 = vld [vmem:[#allocation2 + $0xe8] sm:$0xf0]  ;;  %133 = vst [vmem:[#allocation1] ss:$4 sm:$0xff] %v129_v52  ;;  %v3144_v55 = vor.u32 %v4500_v48, %v3141_v49  ;;  %v3387_v56 = vld [vmem:[#allocation2 + $0x250] sm:$0xf] }
  0x34   :  { %750 = vmatpush.bf16.msra.mxu1 %v3164_v19  ;;  %v4563_v57 = vld [vmem:[#allocation2 + $0x254] sm:$0xf0]  ;;  %v3451_v58 = vld [vmem:[#allocation2 + $0x2d0] sm:$0xf]  ;;  %v3208_v59 = vor.u32 %v4516_v50, %v3205_v51  ;;  %v4498_v61 = vld [vmem:[#allocation2 + $0x54] sm:$0xf] }
  0x35   :  { %763 = vmatpush.bf16.msra.mxu2 %v3228_v20  ;;  %v4579_v60 = vld [vmem:[#allocation2 + $0x2d4] sm:$0xf0]  ;;  %v3133_v62 = vld [vmem:[#allocation2 + $0x58] sm:$0xf0]  ;;  %v4514_v63 = vld [vmem:[#allocation2 + $0xd4] sm:$0xf]  ;;  %v3388_v1 = vor.u32 %v4563_v57, %v3387_v56 }
  0x36   :  { %776 = vmatpush.bf16.msra.mxu3 %v3292_v24  ;;  %v3197_v0 = vld [vmem:[#allocation2 + $0xd8] sm:$0xf0]  ;;  %v3379_v2 = vld [vmem:[#allocation2 + $0x240] sm:$0xf]  ;;  %v4561_v3 = vld [vmem:[#allocation2 + $0x244] sm:$0xf0]  ;;  %v3452_v4 = vor.u32 %v4579_v60, %v3451_v58  ;;  %v3136_v5 = vor.u32 %v4498_v61, %v3133_v62 }
  0x37   :  { %738 = vmatpush.bf16.msra.mxu0 %v3092_v31  ;;  %v3443_v6 = vld [vmem:[#allocation2 + $0x2c0] sm:$0xf]  ;;  %v4577_v7 = vld [vmem:[#allocation2 + $0x2c4] sm:$0xf0]  ;;  %v4496_v8 = vld [vmem:[#allocation2 + $0x44] sm:$0xf]  ;;  %v3200_v9 = vor.u32 %v4514_v63, %v3197_v0  ;;  %v3380_v15 = vor.u32 %v4561_v3, %v3379_v2 }
  0x38   :  { %751 = vmatpush.bf16.msra.mxu1 %v3156_v35  ;;  %v3125_v10 = vld [vmem:[#allocation2 + $0x48] sm:$0xf0]  ;;  %v4512_v11 = vld [vmem:[#allocation2 + $0xc4] sm:$0xf]  ;;  %v3444_v16 = vor.u32 %v4577_v7, %v3443_v6  ;;  %v3371_v22 = vld [vmem:[#allocation2 + $0x230] sm:$0xf] }
  0x39   :  { %764 = vmatpush.bf16.msra.mxu2 %v3220_v36  ;;  %v3189_v12 = vld [vmem:[#allocation2 + $0xc8] sm:$0xf0]  ;;  %v3128_v21 = vor.u32 %v4496_v8, %v3125_v10  ;;  %v4559_v23 = vld [vmem:[#allocation2 + $0x234] sm:$0xf0]  ;;  %v3435_v24 = vld [vmem:[#allocation2 + $0x2b0] sm:$0xf] }
  0x3a   :  { %777 = vmatpush.bf16.msra.mxu3 %v3284_v39  ;;  %v136_v13 = vld.sshfl [vmem:[#allocation1] sm:$0xff pattern:$0x73625140]  ;;  %v137_v14 = vld.sshfl [vmem:[#allocation1 + $0x8] sm:$0xff pattern:$0x73625140]  ;;  %v3192_v27 = vor.u32 %v4512_v11, %v3189_v12  ;;  %v3372_v33 = vor.u32 %v4559_v23, %v3371_v22 }
  0x3b   :  { %783 = vmatpush.bf16.msrb.mxu0 %v3404_v40  ;;  %v5105_v17 = vpack.c.bf16 %v136_v13, %v136_v13  ;;  %v5107_v18 = vpack.c.bf16 %v137_v14, %v137_v14  ;;  %v138_v19 = vld.sshfl [vmem:[#allocation1 + $0x10] sm:$0xff pattern:$0x73625140]  ;;  %v139_v20 = vld.sshfl [vmem:[#allocation1 + $0x18] sm:$0xff pattern:$0x73625140] }
  0x3c   :  { %796 = vmatpush.bf16.msrb.mxu1 %v3468_v41  ;;  %v5109_v25 = vpack.c.bf16 %v138_v19, %v138_v19  ;;  %v5111_v26 = vpack.c.bf16 %v139_v20, %v139_v20  ;;  %v4575_v28 = vld [vmem:[#allocation2 + $0x2b4] sm:$0xf0]  ;;  %v4494_v29 = vld [vmem:[#allocation2 + $0x34] sm:$0xf]  ;;  %v3117_v30 = vld [vmem:[#allocation2 + $0x38] sm:$0xf0] }
  0x3d   :  { %809 = vmatpush.bf16.msrb.mxu2 %v3152_v42  ;;  %739 = vmatmul.bf16.vlgmr.msra.gmra.mxu0 %v5105_v17  ;;  %v4510_v31 = vld [vmem:[#allocation2 + $0xb4] sm:$0xf]  ;;  %v3181_v32 = vld [vmem:[#allocation2 + $0xb8] sm:$0xf0]  ;;  %v3436_v34 = vor.u32 %v4575_v28, %v3435_v24  ;;  %v3120_v35 = vor.u32 %v4494_v29, %v3117_v30  ;;  %v3363_v36 = vld [vmem:[#allocation2 + $0x220] sm:$0xf] }
  0x3e   :  { %822 = vmatpush.bf16.msrb.mxu3 %v3216_v46  ;;  %752 = vmatmul.bf16.vlgmr.msra.gmra.mxu1 %v5107_v18  ;;  %v4557_v37 = vld [vmem:[#allocation2 + $0x224] sm:$0xf0]  ;;  %v3427_v38 = vld [vmem:[#allocation2 + $0x2a0] sm:$0xf]  ;;  %v3184_v39 = vor.u32 %v4510_v31, %v3181_v32  ;;  %v4492_v41 = vld [vmem:[#allocation2 + $0x24] sm:$0xf] }
  0x3f   :  { %784 = vmatpush.bf16.msrb.mxu0 %v3396_v53  ;;  %765 = vmatmul.bf16.vlgmr.msra.gmra.mxu2 %v5109_v25  ;;  %v4573_v40 = vld [vmem:[#allocation2 + $0x2a4] sm:$0xf0]  ;;  %v3109_v42 = vld [vmem:[#allocation2 + $0x28] sm:$0xf0]  ;;  %v4508_v43 = vld [vmem:[#allocation2 + $0xa4] sm:$0xf]  ;;  %v3364_v46 = vor.u32 %v4557_v37, %v3363_v36 }
  0x40   :  { %797 = vmatpush.bf16.msrb.mxu1 %v3460_v54  ;;  %778 = vmatmul.bf16.vlgmr.msra.gmra.mxu3 %v5111_v26  ;;  %v3173_v44 = vld [vmem:[#allocation2 + $0xa8] sm:$0xf0]  ;;  %v130_v45 = vld [vmem:[%s5314_s0 + $0x8] sm:$0xf]  ;;  %v3428_v47 = vor.u32 %v4573_v40, %v3427_v38  ;;  %v3112_v48 = vor.u32 %v4492_v41, %v3109_v42  ;;  %v3355_v49 = vld [vmem:[#allocation2 + $0x210] sm:$0xf] }
  0x41   :  { %810 = vmatpush.bf16.msrb.mxu2 %v3144_v55  ;;  %135 = vst [vmem:[#allocation1 + $0x20] ss:$4 sm:$0xff] %v130_v45  ;;  %v4555_v50 = vld [vmem:[#allocation2 + $0x214] sm:$0xf0]  ;;  %v3419_v51 = vld [vmem:[#allocation2 + $0x290] sm:$0xf]  ;;  %v3176_v52 = vor.u32 %v4508_v43, %v3173_v44 }
  0x42   :  { %823 = vmatpush.bf16.msrb.mxu3 %v3208_v59  ;;  %v4571_v53 = vld [vmem:[#allocation2 + $0x294] sm:$0xf0]  ;;  %v4490_v54 = vld [vmem:[#allocation2 + $0x14] sm:$0xf]  ;;  %v3101_v55 = vld [vmem:[#allocation2 + $0x18] sm:$0xf0]  ;;  %v3356_v58 = vor.u32 %v4555_v50, %v3355_v49 }
  0x43   :  { %785 = vmatpush.bf16.msrb.mxu0 %v3388_v1  ;;  %v4506_v56 = vld [vmem:[#allocation2 + $0x94] sm:$0xf]  ;;  %v3165_v57 = vld [vmem:[#allocation2 + $0x98] sm:$0xf0]  ;;  %v3347_v59 = vld [vmem:[#allocation2 + $0x200] sm:$0xf]  ;;  %v3420_v62 = vor.u32 %v4571_v53, %v3419_v51  ;;  %v3104_v63 = vor.u32 %v4490_v54, %v3101_v55 }
  0x44   :  { %798 = vmatpush.bf16.msrb.mxu1 %v3452_v4  ;;  %v4553_v60 = vld [vmem:[#allocation2 + $0x204] sm:$0xf0]  ;;  %v3411_v61 = vld [vmem:[#allocation2 + $0x280] sm:$0xf]  ;;  %v4488_v1 = vld [vmem:[#allocation2 + $0x4] sm:$0xf]  ;;  %v3168_v3 = vor.u32 %v4506_v56, %v3165_v57 }
  0x45   :  { %811 = vmatpush.bf16.msrb.mxu2 %v3136_v5  ;;  %v4569_v0 = vld [vmem:[#allocation2 + $0x284] sm:$0xf0]  ;;  %v3093_v2 = vld [vmem:[#allocation2 + $0x8] sm:$0xf0]  ;;  %v4504_v4 = vld [vmem:[#allocation2 + $0x84] sm:$0xf]  ;;  %v3348_v10 = vor.u32 %v4553_v60, %v3347_v59 }
  0x46   :  { %824 = vmatpush.bf16.msrb.mxu3 %v3200_v9  ;;  %v3157_v5 = vld [vmem:[#allocation2 + $0x88] sm:$0xf0]  ;;  %v4534_v6 = vld [vmem:[#allocation2 + $0x174] sm:$0xf]  ;;  %v3277_v7 = vld [vmem:[#allocation2 + $0x178] sm:$0xf0]  ;;  %v3412_v14 = vor.u32 %v4569_v0, %v3411_v61 }
  0x47   :  { %786 = vmatpush.bf16.msrb.mxu0 %v3380_v15  ;;  %v4550_v8 = vld [vmem:[#allocation2 + $0x1f4] sm:$0xf]  ;;  %v3341_v9 = vld [vmem:[#allocation2 + $0x1f8] sm:$0xf0]  ;;  %v3096_v15 = vor.u32 %v4488_v1, %v3093_v2  ;;  %v3160_v20 = vor.u32 %v4504_v4, %v3157_v5  ;;  %v3269_v28 = vld [vmem:[#allocation2 + $0x168] sm:$0xf0] }
  0x48   :  { %799 = vmatpush.bf16.msrb.mxu1 %v3444_v16  ;;  %v4566_v11 = vld [vmem:[#allocation2 + $0x274] sm:$0xf]  ;;  %v3405_v12 = vld [vmem:[#allocation2 + $0x278] sm:$0xf0]  ;;  %v3344_v23 = vor.u32 %v4550_v8, %v3341_v9  ;;  %v4548_v29 = vld [vmem:[#allocation2 + $0x1e4] sm:$0xf] }
  0x49   :  { %812 = vmatpush.bf16.msrb.mxu2 %v3128_v21  ;;  %v4582_v13 = vld [vmem:[#allocation2 + $0x2f4] sm:$0xf]  ;;  %v3469_v16 = vld [vmem:[#allocation2 + $0x2f8] sm:$0xf0]  ;;  %v3280_v21 = vor.u32 %v4534_v6, %v3277_v7  ;;  %v3408_v24 = vor.u32 %v4566_v11, %v3405_v12  ;;  %v3333_v32 = vld [vmem:[#allocation2 + $0x1e8] sm:$0xf0] }
  0x4a   :  { %825 = vmatpush.bf16.msrb.mxu3 %v3192_v27  ;;  %v140_v19 = vld.sshfl [vmem:[#allocation1 + $0x20] sm:$0xff pattern:$0x73625140]  ;;  %v141_v22 = vld.sshfl [vmem:[#allocation1 + $0x28] sm:$0xff pattern:$0x73625140]  ;;  %v3472_v30 = vor.u32 %v4582_v13, %v3469_v16 }
  0x4b   :  { %787 = vmatpush.bf16.msrb.mxu0 %v3372_v33  ;;  %v4532_v27 = vld [vmem:[#allocation2 + $0x164] sm:$0xf]  ;;  %v5120_v31 = vpack.c.bf16 %v140_v19, %v140_v19  ;;  %v3461_v37 = vld [vmem:[#allocation2 + $0x2e8] sm:$0xf0]  ;;  %v4530_v41 = vld [vmem:[#allocation2 + $0x154] sm:$0xf] }
  0x4c   :  { %800 = vmatpush.bf16.msrb.mxu1 %v3436_v34  ;;  %v4564_v33 = vld [vmem:[#allocation2 + $0x264] sm:$0xf]  ;;  %v3397_v34 = vld [vmem:[#allocation2 + $0x268] sm:$0xf0]  ;;  %v3272_v38 = vor.u32 %v4532_v27, %v3269_v28  ;;  %v3261_v42 = vld [vmem:[#allocation2 + $0x158] sm:$0xf0] }
  0x4d   :  { %813 = vmatpush.bf16.msrb.mxu2 %v3120_v35  ;;  %v5122_v35 = vpack.c.bf16 %v141_v22, %v141_v22  ;;  %v4580_v36 = vld [vmem:[#allocation2 + $0x2e4] sm:$0xf]  ;;  %v3400_v40 = vor.u32 %v4564_v33, %v3397_v34  ;;  %v4546_v43 = vld [vmem:[#allocation2 + $0x1d4] sm:$0xf]  ;;  %v3325_v45 = vld [vmem:[#allocation2 + $0x1d8] sm:$0xf0]  ;;  %v3264_v50 = vor.u32 %v4530_v41, %v3261_v42 }
  0x4e   :  { %826 = vmatpush.bf16.msrb.mxu3 %v3184_v39  ;;  %v3336_v39 = vor.u32 %v4548_v29, %v3333_v32  ;;  %v3464_v44 = vor.u32 %v4580_v36, %v3461_v37  ;;  %v3453_v49 = vld [vmem:[#allocation2 + $0x2d8] sm:$0xf0]  ;;  %v4528_v51 = vld [vmem:[#allocation2 + $0x144] sm:$0xf]  ;;  %v3328_v54 = vor.u32 %v4546_v43, %v3325_v45  ;;  %v3317_v56 = vld [vmem:[#allocation2 + $0x1c8] sm:$0xf0] }
  0x4f   :  { %788 = vmatpush.bf16.msrb.mxu0 %v3364_v46  ;;  %v4562_v46 = vld [vmem:[#allocation2 + $0x254] sm:$0xf]  ;;  %v4544_v53 = vld [vmem:[#allocation2 + $0x1c4] sm:$0xf]  ;;  %v3381_v59 = vld [vmem:[#allocation2 + $0x248] sm:$0xf0] }
  0x50   :  { %801 = vmatpush.bf16.msrb.mxu1 %v3428_v47  ;;  %v3389_v47 = vld [vmem:[#allocation2 + $0x258] sm:$0xf0]  ;;  %v4560_v57 = vld [vmem:[#allocation2 + $0x244] sm:$0xf]  ;;  %v4542_v1 = vld [vmem:[#allocation2 + $0x1b4] sm:$0xf] }
  0x51   :  { %814 = vmatpush.bf16.msrb.mxu2 %v3112_v48  ;;  %v4578_v48 = vld [vmem:[#allocation2 + $0x2d4] sm:$0xf]  ;;  %v3392_v55 = vor.u32 %v4562_v46, %v3389_v47  ;;  %v4576_v60 = vld [vmem:[#allocation2 + $0x2c4] sm:$0xf]  ;;  %v3245_v0 = vld [vmem:[#allocation2 + $0x138] sm:$0xf0] }
  0x52   :  { %827 = vmatpush.bf16.msrb.mxu3 %v3176_v52  ;;  %v3253_v52 = vld [vmem:[#allocation2 + $0x148] sm:$0xf0]  ;;  %v4558_v4 = vld [vmem:[#allocation2 + $0x234] sm:$0xf]  ;;  %v3373_v5 = vld [vmem:[#allocation2 + $0x238] sm:$0xf0] }
  0x53   :  { %789 = vmatpush.bf16.msrb.mxu0 %v3356_v58  ;;  %v3456_v58 = vor.u32 %v4578_v48, %v3453_v49  ;;  %v3256_v61 = vor.u32 %v4528_v51, %v3253_v52  ;;  %v4574_v6 = vld [vmem:[#allocation2 + $0x2b4] sm:$0xf]  ;;  %v3437_v7 = vld [vmem:[#allocation2 + $0x2b8] sm:$0xf0]  ;;  %v4524_v11 = vld [vmem:[#allocation2 + $0x124] sm:$0xf] }
  0x54   :  { %802 = vmatpush.bf16.msrb.mxu1 %v3420_v62  ;;  %v3320_v62 = vor.u32 %v4544_v53, %v3317_v56  ;;  %v3237_v12 = vld [vmem:[#allocation2 + $0x128] sm:$0xf0]  ;;  %v4540_v13 = vld [vmem:[#allocation2 + $0x1a4] sm:$0xf]  ;;  %v4522_v27 = vld [vmem:[#allocation2 + $0x114] sm:$0xf] }
  0x55   :  { %815 = vmatpush.bf16.msrb.mxu2 %v3104_v63  ;;  %v4526_v63 = vld [vmem:[#allocation2 + $0x134] sm:$0xf]  ;;  %v4556_v16 = vld [vmem:[#allocation2 + $0x224] sm:$0xf]  ;;  %v3365_v19 = vld [vmem:[#allocation2 + $0x228] sm:$0xf0]  ;;  %v3240_v22 = vor.u32 %v4524_v11, %v3237_v12 }
  0x56   :  { %828 = vmatpush.bf16.msrb.mxu3 %v3168_v3  ;;  %v3309_v3 = vld [vmem:[#allocation2 + $0x1b8] sm:$0xf0]  ;;  %v3248_v8 = vor.u32 %v4526_v63, %v3245_v0  ;;  %v4538_v29 = vld [vmem:[#allocation2 + $0x194] sm:$0xf]  ;;  %v4520_v41 = vld [vmem:[#allocation2 + $0x104] sm:$0xf] }
  0x57   :  { %790 = vmatpush.bf16.msrb.mxu0 %v3348_v10  ;;  %v3312_v9 = vor.u32 %v4542_v1, %v3309_v3  ;;  %v3376_v10 = vor.u32 %v4558_v4, %v3373_v5  ;;  %v3229_v28 = vld [vmem:[#allocation2 + $0x118] sm:$0xf0]  ;;  %v4554_v33 = vld [vmem:[#allocation2 + $0x214] sm:$0xf]  ;;  %v3221_v42 = vld [vmem:[#allocation2 + $0x108] sm:$0xf0] }
  0x58   :  { %803 = vmatpush.bf16.msrb.mxu1 %v3412_v14  ;;  %v3440_v14 = vor.u32 %v4574_v6, %v3437_v7  ;;  %v3293_v32 = vld [vmem:[#allocation2 + $0x198] sm:$0xf0]  ;;  %v4570_v36 = vld [vmem:[#allocation2 + $0x294] sm:$0xf]  ;;  %v4536_v43 = vld [vmem:[#allocation2 + $0x184] sm:$0xf] }
  0x59   :  { %816 = vmatpush.bf16.msrb.mxu2 %v3096_v15  ;;  %v3301_v15 = vld [vmem:[#allocation2 + $0x1a8] sm:$0xf0]  ;;  %v3357_v34 = vld [vmem:[#allocation2 + $0x218] sm:$0xf0]  ;;  %v4552_v46 = vld [vmem:[#allocation2 + $0x204] sm:$0xf] }
  0x5a   :  { %829 = vmatpush.bf16.msrb.mxu3 %v3160_v20  ;;  %791 = vmatmul.bf16.vlgmr.msrb.gmra.mxu0 %v5120_v31  ;;  %v4572_v20 = vld [vmem:[#allocation2 + $0x2a4] sm:$0xf]  ;;  %v3421_v37 = vld [vmem:[#allocation2 + $0x298] sm:$0xf0]  ;;  %v3285_v45 = vld [vmem:[#allocation2 + $0x188] sm:$0xf0] }
  0x5b   :  { %835 = vmatpush.bf16.msra.mxu0 %v3280_v21  ;;  %804 = vmatmul.bf16.vlgmr.msrb.gmra.mxu1 %v5122_v35  ;;  %v3429_v21 = vld [vmem:[#allocation2 + $0x2a8] sm:$0xf0]  ;;  %v4568_v48 = vld [vmem:[#allocation2 + $0x284] sm:$0xf]  ;;  %v3288_v51 = vor.u32 %v4536_v43, %v3285_v45  ;;  %v154_v7 = vld [vmem:[%s5316_s2] sm:$0x3] }
  0x5c   :  { %848 = vmatpush.bf16.msra.mxu1 %v3344_v23  ;;  %817 = vmatmul.bf16.vlgmr.msrb.gmra.mxu2 %v5105_v17  ;;  %v3445_v17 = vld [vmem:[#allocation2 + $0x2c8] sm:$0xf0]  ;;  %v3304_v23 = vor.u32 %v4540_v13, %v3301_v15  ;;  %v4589_v56 = vld [vmem:[%s5317_s3 + $0x28] sm:$0xff]  ;;  %v888_v12 = vperm.slane %v154_v7, 0  ;;  %vm3071_vm9 = vcmask 1041408   ;;  %s5336_s25 = sld [smem:[#allocation13_spill]] }
  0x5d   :  { %861 = vmatpush.bf16.msra.mxu2 %v3408_v24  ;;  %830 = vmatmul.bf16.vlgmr.msrb.gmra.mxu3 %v5107_v18  ;;  %v3384_v18 = vor.u32 %v4560_v57, %v3381_v59  ;;  %v3448_v2 = vor.u32 %v4576_v60, %v3445_v17  ;;  %v3368_v24 = vor.u32 %v4556_v16, %v3365_v19  ;;  %v3349_v47 = vld [vmem:[#allocation2 + $0x208] sm:$0xf0]  ;;  %v4584_v57 = vld [vmem:[%s5317_s3] sm:$0xff]  ;;  %v4599_v60 = vld [vmem:[%s5317_s3 + $0x78] sm:$0xff] }
  0x5e   :  { %874 = vmatpush.bf16.msra.mxu3 %v3472_v30  ;;  %v3432_v30 = vor.u32 %v4572_v20, %v3429_v21  ;;  %v3413_v49 = vld [vmem:[#allocation2 + $0x288] sm:$0xf0]  ;;  %v3352_v52 = vor.u32 %v4552_v46, %v3349_v47  ;;  %v4593_v20 = vld [vmem:[%s5317_s3 + $0x48] sm:$0xff] }
  0x5f   :  { %836 = vmatpush.bf16.msra.mxu0 %v3272_v38  ;;  %v3232_v38 = vor.u32 %v4522_v27, %v3229_v28  ;;  %v3416_v53 = vor.u32 %v4568_v48, %v3413_v49  ;;  %v4598_v17 = vld [vmem:[%s5317_s3 + $0x70] sm:$0xff]  ;;  %v4592_v27 = vld [vmem:[%s5317_s3 + $0x40] sm:$0xff]  ;;  %v4607_v49 = vld [vmem:[%s5319_s5 + $0x38] sm:$0xff] }
  0x60   :  { %849 = vmatpush.bf16.msra.mxu1 %v3336_v39  ;;  %v3296_v39 = vor.u32 %v4538_v29, %v3293_v32 }
  0x61   :  { %862 = vmatpush.bf16.msra.mxu2 %v3400_v40  ;;  %v3360_v40 = vor.u32 %v4554_v33, %v3357_v34 }
  0x62   :  { %875 = vmatpush.bf16.msra.mxu3 %v3464_v44  ;;  %v3424_v44 = vor.u32 %v4570_v36, %v3421_v37 }
  0x63   :  { %837 = vmatpush.bf16.msra.mxu0 %v3264_v50  ;;  %v3224_v50 = vor.u32 %v4520_v41, %v3221_v42 }
  0x64   :  { %850 = vmatpush.bf16.msra.mxu1 %v3328_v54  ;;  %v4591_v54 = vld [vmem:[%s5317_s3 + $0x38] sm:$0xff] }
  0x65   :  { %863 = vmatpush.bf16.msra.mxu2 %v3392_v55  ;;  %v4590_v55 = vld [vmem:[%s5317_s3 + $0x30] sm:$0xff] }
  0x66   :  { %876 = vmatpush.bf16.msra.mxu3 %v3456_v58 }
  0x67   :  { %838 = vmatpush.bf16.msra.mxu0 %v3256_v61 }
  0x68   :  { %851 = vmatpush.bf16.msra.mxu1 %v3320_v62  ;;  %v4597_v62 = vld [vmem:[%s5317_s3 + $0x68] sm:$0xff] }
  0x69   :  { %864 = vmatpush.bf16.msra.mxu2 %v3384_v18 }
  0x6a   :  { %877 = vmatpush.bf16.msra.mxu3 %v3448_v2  ;;  %v4596_v2 = vld [vmem:[%s5317_s3 + $0x60] sm:$0xff] }
  0x6b   :  { %839 = vmatpush.bf16.msra.mxu0 %v3248_v8  ;;  %v4595_v8 = vld [vmem:[%s5317_s3 + $0x58] sm:$0xff] }
  0x6c   :  { %852 = vmatpush.bf16.msra.mxu1 %v3312_v9 }
  0x6d   :  { %865 = vmatpush.bf16.msra.mxu2 %v3376_v10 }
  0x6e   :  { %878 = vmatpush.bf16.msra.mxu3 %v3440_v14  ;;  %v4594_v14 = vld [vmem:[%s5317_s3 + $0x50] sm:$0xff] }
  0x6f   :  { %840 = vmatpush.bf16.msra.mxu0 %v3240_v22 }
  0x70   :  { %853 = vmatpush.bf16.msra.mxu1 %v3304_v23 }
  0x71   :  { %866 = vmatpush.bf16.msra.mxu2 %v3368_v24 }
  0x72   :  { %879 = vmatpush.bf16.msra.mxu3 %v3432_v30 }
  0x73   :  { %841 = vmatpush.bf16.msra.mxu0 %v3232_v38 }
  0x74   :  { %854 = vmatpush.bf16.msra.mxu1 %v3296_v39 }
  0x75   :  { %867 = vmatpush.bf16.msra.mxu2 %v3360_v40  ;;  %v889_v40 = vperm.slane %v154_v7, 1 }
  0x76   :  { %880 = vmatpush.bf16.msra.mxu3 %v3424_v44 }
  0x77   :  { %842 = vmatpush.bf16.msra.mxu0 %v3224_v50  ;;  %v4606_v50 = vld [vmem:[%s5319_s5 + $0x30] sm:$0xff] }
  0x78   :  { %855 = vmatpush.bf16.msra.mxu1 %v3288_v51  ;;  %v4605_v51 = vld [vmem:[%s5319_s5 + $0x28] sm:$0xff] }
  0x79   :  { %868 = vmatpush.bf16.msra.mxu2 %v3352_v52  ;;  %v3708_v52 = vld [vmem:[#allocation6 + $0x70] sm:$0xf] }
  0x7a   :  { %881 = vmatpush.bf16.msra.mxu3 %v3416_v53  ;;  %843 = vmatmul.bf16.vlgmr.msra.gmra.mxu0 %v5109_v25  ;;  %v4588_v25 = vld [vmem:[%s5317_s3 + $0x20] sm:$0xff] }
  0x7b   :  { %1027 = vmatpush.bf16.msrb.mxu0 %v4591_v54  ;;  %856 = vmatmul.bf16.vlgmr.msra.gmra.mxu1 %v5111_v26  ;;  %v4587_v26 = vld [vmem:[%s5317_s3 + $0x18] sm:$0xff]  ;;  %v4643_v53 = vld [vmem:[#allocation6 + $0x74] sm:$0xf0]  ;;  %v3700_v54 = vld [vmem:[#allocation6 + $0x60] sm:$0xf] }
  0x7c   :  { %869 = vmatmul.bf16.vlgmr.msra.gmra.mxu2 %v5120_v31  ;;  %v4586_v31 = vld [vmem:[%s5317_s3 + $0x10] sm:$0xff]  ;;  %1040 = vmatpush.bf16.msrb.mxu1 %v4599_v60 }
  0x7d   :  { %882 = vmatmul.bf16.vlgmr.msra.gmra.mxu3 %v5122_v35  ;;  %v4585_v35 = vld [vmem:[%s5317_s3 + $0x8] sm:$0xff]  ;;  %1124 = vmatpush.bf16.msrb.mxu2 %v4607_v49  ;;  %v4637_v60 = vld [vmem:[#allocation6 + $0x44] sm:$0xf0] }
  0x7f   :  { %1028 = vmatpush.bf16.msrb.mxu0 %v4590_v55  ;;  %v4604_v55 = vld [vmem:[%s5319_s5 + $0x20] sm:$0xff] }
  0x80   :  { %1041 = vmatpush.bf16.msrb.mxu1 %v4598_v17  ;;  %v4602_v17 = vld [vmem:[%s5319_s5 + $0x10] sm:$0xff] }
  0x81   :  { %1125 = vmatpush.bf16.msrb.mxu2 %v4606_v50 }
  0x83   :  { %1029 = vmatpush.bf16.msrb.mxu0 %v4589_v56  ;;  %v3709_v56 = vor.u32 %v4643_v53, %v3708_v52  ;;  %v4610_v53 = vld [vmem:[%s5321_s7 + $0x10] sm:$0xff] }
  0x84   :  { %1042 = vmatpush.bf16.msrb.mxu1 %v4597_v62  ;;  %v3676_v62 = vld [vmem:[#allocation6 + $0x30] sm:$0xf] }
  0x85   :  { %1126 = vmatpush.bf16.msrb.mxu2 %v4605_v51 }
  0x87   :  { %1030 = vmatpush.bf16.msrb.mxu0 %v4588_v25  ;;  %v4641_v25 = vld [vmem:[#allocation6 + $0x64] sm:$0xf0] }
  0x88   :  { %1043 = vmatpush.bf16.msrb.mxu1 %v4596_v2  ;;  %v3710_v2 = vld [vmem:[#allocation6 + $0x78] sm:$0xf0] }
  0x89   :  { %1127 = vmatpush.bf16.msrb.mxu2 %v4604_v55  ;;  %v4608_v55 = vld [vmem:[%s5321_s7] sm:$0xff] }
  0x8b   :  { %1031 = vmatpush.bf16.msrb.mxu0 %v4587_v26  ;;  %v3701_v26 = vor.u32 %v4641_v25, %v3700_v54  ;;  %v4609_v54 = vld [vmem:[%s5321_s7 + $0x8] sm:$0xff]  ;;  %v4627_v25 = vld [vmem:[#allocation4 + $0x74] sm:$0xf0] }
  0x8c   :  { %1044 = vmatpush.bf16.msrb.mxu1 %v4595_v8  ;;  %v4640_v8 = vld [vmem:[#allocation6 + $0x64] sm:$0xf] }
  0x8f   :  { %1032 = vmatpush.bf16.msrb.mxu0 %v4586_v31  ;;  %v3692_v31 = vld [vmem:[#allocation6 + $0x50] sm:$0xf] }
  0x90   :  { %1045 = vmatpush.bf16.msrb.mxu1 %v4594_v14  ;;  %v4638_v14 = vld [vmem:[#allocation6 + $0x54] sm:$0xf] }
  0x93   :  { %1033 = vmatpush.bf16.msrb.mxu0 %v4585_v35  ;;  %v4639_v35 = vld [vmem:[#allocation6 + $0x54] sm:$0xf0] }
  0x94   :  { %1046 = vmatpush.bf16.msrb.mxu1 %v4593_v20 }
  0x97   :  { %1034 = vmatpush.bf16.msrb.mxu0 %v4584_v57  ;;  %v4603_v57 = vld [vmem:[%s5319_s5 + $0x18] sm:$0xff] }
  0x98   :  { %1047 = vmatpush.bf16.msrb.mxu1 %v4592_v27  ;;  %1128 = vmatpush.bf16.msrb.mxu2 %v4603_v57  ;;  %v3636_v57 = vld [vmem:[#allocation4 + $0x60] sm:$0xf] }
  0x9c   :  { %1425 = vmatpush.bf16.msra.mxu1 %v3709_v56  ;;  %1129 = vmatpush.bf16.msrb.mxu2 %v4602_v17  ;;  %v3644_v56 = vld [vmem:[#allocation4 + $0x70] sm:$0xf]  ;;  %v4624_v17 = vld [vmem:[#allocation4 + $0x64] sm:$0xf] }
  0xa0   :  { %1426 = vmatpush.bf16.msra.mxu1 %v3701_v26  ;;  %v4626_v26 = vld [vmem:[#allocation4 + $0x74] sm:$0xf] }
  0xba   :  { %v740_v58 = vpop.f32.mrf.mxu0 }
  0xbb   :  { %v753_v59 = vpop.f32.mrf.mxu1 }
  0xbc   :  { %v754_v1 = vadd.f32 %v753_v59, %v740_v58  ;;  %v3693_v58 = vor.u32 %v4639_v35, %v3692_v31  ;;  %v3684_v59 = vld [vmem:[#allocation6 + $0x40] sm:$0xf]  ;;  %v3645_v31 = vor.u32 %v4627_v25, %v3644_v56  ;;  %v3646_v35 = vld [vmem:[#allocation4 + $0x78] sm:$0xf0]  ;;  %v4078_v56 = vld [vmem:[#allocation7 + $0x2e8] sm:$0xf0] }
  0xbd   :  { %v4052_v25 = vld [vmem:[#allocation7 + $0x2a0] sm:$0xf] }
  0xbe   :  { %1427 = vmatpush.bf16.msra.mxu1 %v3693_v58  ;;  %v4625_v58 = vld [vmem:[#allocation4 + $0x64] sm:$0xf0] }
  0xc2   :  { %v766_v61 = vpop.f32.mrf.mxu2  ;;  %v742_v18 = vpop.f32.mrf.mxu0 }
  0xc3   :  { %v779_v63 = vpop.f32.mrf.mxu3  ;;  %v755_v0 = vpop.f32.mrf.mxu1  ;;  %v767_v3 = vadd.f32 %v766_v61, %v754_v1  ;;  %v3685_v61 = vor.u32 %v4637_v60, %v3684_v59  ;;  %v4635_v18 = vld [vmem:[#allocation6 + $0x34] sm:$0xf0]  ;;  %v4642_v1 = vld [vmem:[#allocation6 + $0x74] sm:$0xf]  ;;  %v3649_v60 = vor.u32 %v4626_v26, %v3646_v35  ;;  %v4728_v35 = vld [vmem:[#allocation7 + $0x2a4] sm:$0xf] }
  0xc4   :  { %v3677_v0 = vor.u32 %v4635_v18, %v3676_v62  ;;  %v3637_v62 = vor.u32 %v4625_v58, %v3636_v57  ;;  %v4731_v26 = vld [vmem:[#allocation7 + $0x2b4] sm:$0xf0]  ;;  %v4054_v57 = vld [vmem:[#allocation7 + $0x2b8] sm:$0xf0]  ;;  %v3884_v58 = vld [vmem:[#allocation7 + $0x150] sm:$0xf] }
  0xc5   :  { %v780_v6 = vadd.f32 %v779_v63, %v767_v3  ;;  %v4601_v63 = vld [vmem:[%s5319_s5 + $0x8] sm:$0xff]  ;;  %1428 = vmatpush.bf16.msra.mxu1 %v3685_v61  ;;  %v3638_v61 = vld [vmem:[#allocation4 + $0x68] sm:$0xf0]  ;;  %1309 = vmatpush.bf16.msra.mxu0 %v3649_v60  ;;  %v4053_v60 = vor.u32 %v4731_v26, %v4052_v25  ;;  %v4659_v26 = vld [vmem:[#allocation7 + $0x74] sm:$0xf0] }
  0xc6   :  { %v3668_v3 = vld [vmem:[#allocation6 + $0x20] sm:$0xf]  ;;  %1130 = vmatpush.bf16.msrb.mxu2 %v4601_v63  ;;  %v3641_v18 = vor.u32 %v4624_v17, %v3638_v61  ;;  %v3628_v63 = vld [vmem:[#allocation4 + $0x50] sm:$0xf]  ;;  %v4689_v17 = vld [vmem:[#allocation7 + $0x164] sm:$0xf0] }
  0xc7   :  { %v4686_v61 = vld [vmem:[#allocation7 + $0x154] sm:$0xf] }
  0xc9   :  { %1429 = vmatpush.bf16.msra.mxu1 %v3677_v0  ;;  %v4623_v0 = vld [vmem:[#allocation4 + $0x54] sm:$0xf0]  ;;  %1310 = vmatpush.bf16.msra.mxu0 %v3641_v18  ;;  %v4057_v18 = vor.u32 %v4728_v35, %v4054_v57  ;;  %v3766_v35 = vld [vmem:[#allocation7 + $0x78] sm:$0xf0] }
  0xca   :  { %v768_v4 = vpop.f32.mrf.mxu2 }
  0xcb   :  { %v781_v5 = vpop.f32.mrf.mxu3  ;;  %v4633_v4 = vld [vmem:[#allocation6 + $0x24] sm:$0xf0] }
  0xcc   :  { %v4600_v5 = vld [vmem:[%s5319_s5] sm:$0xff]  ;;  %v3669_v7 = vor.u32 %v4633_v4, %v3668_v3  ;;  %v3629_v4 = vor.u32 %v4623_v0, %v3628_v63  ;;  %v3885_v63 = vor.u32 %v4689_v17, %v3884_v58  ;;  %v3932_v58 = vld [vmem:[#allocation7 + $0x1b0] sm:$0xf] }
  0xcd   :  { %1131 = vmatpush.bf16.msrb.mxu2 %v4600_v5  ;;  %v3630_v3 = vld [vmem:[#allocation4 + $0x58] sm:$0xf0]  ;;  %v4847_v17 = vld [vmem:[%s5322_s8] ss:$0 sm:$0xff] }
  0xce   :  { %1430 = vmatpush.bf16.msra.mxu1 %v3669_v7  ;;  %v3620_v7 = vld [vmem:[#allocation4 + $0x40] sm:$0xf] }
  0xd7   :  { %v792_v9 = vpop.f32.mrf.mxu0 }
  0xd8   :  { %v793_v10 = vadd.f32 %v792_v9, %v780_v6  ;;  %v805_v11 = vpop.f32.mrf.mxu1  ;;  %v3713_v6 = vor.u32 %v4642_v1, %v3710_v2  ;;  %v3702_v9 = vld [vmem:[#allocation6 + $0x68] sm:$0xf0]  ;;  %v4846_v1 = vld [vmem:[%s5320_s6] ss:$0 sm:$0xff]  ;;  %v4622_v2 = vld [vmem:[#allocation4 + $0x54] sm:$0xf] }
  0xda   :  { %v806_v13 = vadd.f32 %v805_v11, %v793_v10  ;;  %1438 = vmatpush.bf16.msra.mxu2 %v3713_v6  ;;  %v3705_v10 = vor.u32 %v4640_v8, %v3702_v9  ;;  %v3633_v6 = vor.u32 %v4622_v2, %v3630_v3  ;;  %v4621_v9 = vld [vmem:[#allocation4 + $0x44] sm:$0xf0]  ;;  %v4722_v3 = vld [vmem:[#allocation7 + $0x274] sm:$0xf] }
  0xdb   :  { %v4725_v2 = vld [vmem:[#allocation7 + $0x284] sm:$0xf0] }
  0xdc   :  { %v892_v15 = vadd.f32 %v888_v12, %v806_v13  ;;  %v3660_v12 = vld [vmem:[#allocation6 + $0x10] sm:$0xf]  ;;  %v4631_v13 = vld [vmem:[#allocation6 + $0x14] sm:$0xf0]  ;;  %1311 = vmatpush.bf16.msra.mxu0 %v3633_v6 }
  0xdd   :  { %v4683_v6 = vld [vmem:[#allocation7 + $0x134] sm:$0xf0] }
  0xde   :  { %v894_v16 = vmax.f32 %v892_v15, 0.0  ;;  %1439 = vmatpush.bf16.msra.mxu2 %v3705_v10  ;;  %v3661_v15 = vor.u32 %v4631_v13, %v3660_v12  ;;  %v4620_v10 = vld [vmem:[#allocation4 + $0x44] sm:$0xf] }
  0xdf   :  { %v818_v19 = vpop.f32.mrf.mxu2  ;;  %v794_v22 = vpop.f32.mrf.mxu0 }
  0xe0   :  { %v831_v21 = vpop.f32.mrf.mxu3  ;;  %v5180_v23 = vpack.c.bf16 %v894_v16, %v894_v16  ;;  %v807_v24 = vpop.f32.mrf.mxu1  ;;  %v3694_v16 = vld [vmem:[#allocation6 + $0x58] sm:$0xf0]  ;;  %1431 = vmatpush.bf16.msra.mxu1 %v3661_v15  ;;  %v4629_v22 = vld [vmem:[#allocation6 + $0x4] sm:$0xf0] }
  0xe1   :  { %v832_v30 = vadd.f32 %v831_v21, %v818_v19  ;;  %v3697_v19 = vor.u32 %v4638_v14, %v3694_v16  ;;  %v3652_v21 = vld [vmem:[#allocation6] sm:$0xf]  ;;  %v4636_v24 = vld [vmem:[#allocation6 + $0x44] sm:$0xf]  ;;  %v3621_v14 = vor.u32 %v4621_v9, %v3620_v7  ;;  %v3612_v16 = vld [vmem:[#allocation4 + $0x30] sm:$0xf] }
  0xe2   :  { %1035 = vmatmul.bf16.vlgmr.msrb.gmra.mxu0 %v5180_v23  ;;  %v3653_v27 = vor.u32 %v4629_v22, %v3652_v21  ;;  %v4618_v21 = vld [vmem:[#allocation4 + $0x34] sm:$0xf]  ;;  %v3614_v22 = vld [vmem:[#allocation4 + $0x38] sm:$0xf0] }
  0xe3   :  { %1440 = vmatpush.bf16.msra.mxu2 %v3697_v19  ;;  %v3862_v9 = vld [vmem:[#allocation7 + $0x138] sm:$0xf0] }
  0xe4   :  { %1432 = vmatpush.bf16.msra.mxu1 %v3653_v27 }
  0xe7   :  { %v820_v28 = vpop.f32.mrf.mxu2 }
  0xe8   :  { %v833_v29 = vpop.f32.mrf.mxu3  ;;  %v3686_v28 = vld [vmem:[#allocation6 + $0x48] sm:$0xf0] }
  0xe9   :  { %v3689_v29 = vor.u32 %v4636_v24, %v3686_v28  ;;  %v3617_v28 = vor.u32 %v4618_v21, %v3614_v22  ;;  %v4006_v21 = vld [vmem:[#allocation7 + $0x258] sm:$0xf0]  ;;  %v3838_v22 = vld [vmem:[#allocation7 + $0x108] sm:$0xf0] }
  0xeb   :  { %1441 = vmatpush.bf16.msra.mxu2 %v3689_v29  ;;  %v3604_v29 = vld [vmem:[#allocation4 + $0x20] sm:$0xf] }
  0xf7   :  { %v844_v32 = vpop.f32.mrf.mxu0 }
  0xf8   :  { %v857_v33 = vpop.f32.mrf.mxu1  ;;  %v845_v34 = vadd.f32 %v844_v32, %v832_v30  ;;  %v4634_v30 = vld [vmem:[#allocation6 + $0x34] sm:$0xf]  ;;  %v3678_v32 = vld [vmem:[#allocation6 + $0x38] sm:$0xf0] }
  0xfa   :  { %v858_v36 = vadd.f32 %v857_v33, %v845_v34  ;;  %v3681_v33 = vor.u32 %v4634_v30, %v3678_v32  ;;  %v4632_v34 = vld [vmem:[#allocation6 + $0x24] sm:$0xf]  ;;  %v4617_v30 = vld [vmem:[#allocation4 + $0x24] sm:$0xf0] }
  0xfb   :  { %v4616_v32 = vld [vmem:[#allocation4 + $0x24] sm:$0xf] }
  0xfc   :  { %1442 = vmatpush.bf16.msra.mxu2 %v3681_v33  ;;  %v3606_v33 = vld [vmem:[#allocation4 + $0x28] sm:$0xf0] }
  0xff   :  { %v870_v37 = vpop.f32.mrf.mxu2  ;;  %v846_v41 = vpop.f32.mrf.mxu0 }
 0x100   :  { %v871_v38 = vadd.f32 %v870_v37, %v858_v36  ;;  %v883_v39 = vpop.f32.mrf.mxu3  ;;  %v859_v42 = vpop.f32.mrf.mxu1  ;;  %v3670_v36 = vld [vmem:[#allocation6 + $0x28] sm:$0xf0]  ;;  %v4628_v41 = vld [vmem:[#allocation6 + $0x4] sm:$0xf] }
 0x101   :  { %v3673_v37 = vor.u32 %v4632_v34, %v3670_v36  ;;  %v3654_v42 = vld [vmem:[#allocation6 + $0x8] sm:$0xf0]  ;;  %v3605_v34 = vor.u32 %v4617_v30, %v3604_v29  ;;  %v3609_v36 = vor.u32 %v4616_v32, %v3606_v33  ;;  %v4671_v30 = vld [vmem:[#allocation7 + $0xd4] sm:$0xf0]  ;;  %v4668_v32 = vld [vmem:[#allocation7 + $0xc4] sm:$0xf] }
 0x102   :  { %v884_v43 = vadd.f32 %v883_v39, %v871_v38  ;;  %v4630_v38 = vld [vmem:[#allocation6 + $0x14] sm:$0xf]  ;;  %v3662_v39 = vld [vmem:[#allocation6 + $0x18] sm:$0xf0] }
 0x103   :  { %1443 = vmatpush.bf16.msra.mxu2 %v3673_v37  ;;  %v3814_v33 = vld [vmem:[#allocation7 + $0xd8] sm:$0xf0] }
 0x104   :  { %v893_v44 = vadd.f32 %v889_v40, %v884_v43  ;;  %v3665_v40 = vor.u32 %v4630_v38, %v3662_v39  ;;  %v3657_v43 = vor.u32 %v4628_v41, %v3654_v42  ;;  %v3596_v39 = vld [vmem:[#allocation4 + $0x10] sm:$0xf]  ;;  %v4614_v41 = vld [vmem:[#allocation4 + $0x14] sm:$0xf] }
 0x106   :  { %v895_v45 = vmax.f32 %v893_v44, 0.0  ;;  %v4611_v44 = vld [vmem:[%s5321_s7 + $0x18] sm:$0xff] }
 0x107   :  { %v872_v46 = vpop.f32.mrf.mxu2  ;;  %1444 = vmatpush.bf16.msra.mxu2 %v3665_v40  ;;  %1184 = vmatpush.bf16.msrb.mxu3 %v4611_v44  ;;  %v4615_v40 = vld [vmem:[#allocation4 + $0x14] sm:$0xf0] }
 0x108   :  { %v5186_v47 = vpack.c.bf16 %v895_v45, %v895_v45  ;;  %v885_v48 = vpop.f32.mrf.mxu3  ;;  %v4845_v45 = vld [vmem:[%s5318_s4] ss:$0 sm:$0xff]  ;;  %v3597_v42 = vor.u32 %v4615_v40, %v3596_v39  ;;  %v4710_v39 = vld [vmem:[#allocation7 + $0x214] sm:$0xf]  ;;  %v3982_v40 = vld [vmem:[#allocation7 + $0x228] sm:$0xf0] }
 0x10a   :  { %1048 = vmatmul.bf16.vlgmr.msrb.gmra.mxu1 %v5186_v47 }
 0x10b   :  { %1445 = vmatpush.bf16.msra.mxu2 %v3657_v43  ;;  %1185 = vmatpush.bf16.msrb.mxu3 %v4610_v53  ;;  %v3598_v43 = vld [vmem:[#allocation4 + $0x18] sm:$0xf0]  ;;  %v4737_v53 = vld [vmem:[#allocation7 + $0x2e4] sm:$0xf0] }
 0x10c   :  { %v3601_v44 = vor.u32 %v4614_v41, %v3598_v43  ;;  %v3788_v43 = vld [vmem:[#allocation7 + $0x90] sm:$0xf] }
 0x10f   :  { %1186 = vmatpush.bf16.msrb.mxu3 %v4609_v54  ;;  %v4734_v54 = vld [vmem:[#allocation7 + $0x2d4] sm:$0xf] }
 0x113   :  { %1187 = vmatpush.bf16.msrb.mxu3 %v4608_v55 }
 0x117   :  { %1296 = vmatpush.bf16.msra.mxu3 %v3645_v31  ;;  %v4081_v31 = vor.u32 %v4734_v54, %v4078_v56  ;;  %v3764_v56 = vld [vmem:[#allocation7 + $0x60] sm:$0xf] }
 0x11b   :  { %1297 = vmatpush.bf16.msra.mxu3 %v3637_v62  ;;  %v3886_v62 = vld [vmem:[#allocation7 + $0x168] sm:$0xf0] }
 0x11c   :  { %v3889_v0 = vor.u32 %v4686_v61, %v3886_v62  ;;  %v4698_v61 = vld [vmem:[#allocation7 + $0x1b4] sm:$0xf]  ;;  %v3934_v62 = vld [vmem:[#allocation7 + $0x1c8] sm:$0xf0] }
 0x11e   :  { %2060 = vmatpush.bf16.msrb.mxu1 %v3889_v0  ;;  %v3740_v0 = vld [vmem:[#allocation7 + $0x30] sm:$0xf] }
 0x11f   :  { %1298 = vmatpush.bf16.msra.mxu3 %v3629_v4  ;;  %v4030_v4 = vld [vmem:[#allocation7 + $0x288] sm:$0xf0] }
 0x123   :  { %1299 = vmatpush.bf16.msra.mxu3 %v3621_v14  ;;  %v4033_v14 = vor.u32 %v4722_v3, %v4030_v4  ;;  %v4695_v3 = vld [vmem:[#allocation7 + $0x194] sm:$0xf0]  ;;  %v4653_v4 = vld [vmem:[#allocation7 + $0x44] sm:$0xf0] }
 0x15f   :  { %v1036_v11 = vpop.f32.mrf.mxu0 }
 0x167   :  { %v1038_v20 = vpop.f32.mrf.mxu0 }
 0x168   :  { %v4619_v20 = vld [vmem:[#allocation4 + $0x34] sm:$0xf0] }
 0x169   :  { %v3613_v27 = vor.u32 %v4619_v20, %v3612_v16  ;;  %v4677_v16 = vld [vmem:[#allocation7 + $0x104] sm:$0xf0]  ;;  %v4716_v20 = vld [vmem:[#allocation7 + $0x244] sm:$0xf] }
 0x16b   :  { %1300 = vmatpush.bf16.msra.mxu3 %v3613_v27 }
 0x16f   :  { %1301 = vmatpush.bf16.msra.mxu3 %v3605_v34  ;;  %v4009_v34 = vor.u32 %v4716_v20, %v4006_v21  ;;  %v3716_v20 = vld [vmem:[#allocation7] sm:$0xf]  ;;  %v4647_v21 = vld [vmem:[#allocation7 + $0x14] sm:$0xf0] }
 0x173   :  { %1302 = vmatpush.bf16.msra.mxu3 %v3597_v42  ;;  %v3817_v42 = vor.u32 %v4668_v32, %v3814_v33  ;;  %v4690_v32 = vld [vmem:[#allocation7 + $0x16c] sm:$0xf0]  ;;  %v4687_v33 = vld [vmem:[#allocation7 + $0x15c] sm:$0xf] }
 0x187   :  { %v1049_v46 = vpop.f32.mrf.mxu1 }
 0x188   :  { %v1050_v48 = vadd.f32 %v1049_v46, %v1036_v11  ;;  %v3622_v11 = vld [vmem:[#allocation4 + $0x48] sm:$0xf0]  ;;  %v4613_v46 = vld [vmem:[#allocation4 + $0x4] sm:$0xf0] }
 0x189   :  { %v3625_v15 = vor.u32 %v4620_v10, %v3622_v11 }
 0x18a   :  { %v1056_v49 = vadd.f32 %v4845_v45, %v1050_v48  ;;  %v3588_v45 = vld [vmem:[#allocation4] sm:$0xf]  ;;  %v4612_v48 = vld [vmem:[#allocation4 + $0x4] sm:$0xf] }
 0x18b   :  { %1312 = vmatpush.bf16.msra.mxu0 %v3625_v15  ;;  %v3836_v15 = vld [vmem:[#allocation7 + $0xf0] sm:$0xf] }
 0x18c   :  { %v1057_v50 = vmax.f32 %v1056_v49, 0.0  ;;  %v3589_v49 = vor.u32 %v4613_v46, %v3588_v45  ;;  %v4665_v45 = vld [vmem:[#allocation7 + $0xa4] sm:$0xf0]  ;;  %v4662_v46 = vld [vmem:[#allocation7 + $0x94] sm:$0xf] }
 0x18d   :  { %v3789_v54 = vor.u32 %v4665_v45, %v3788_v43  ;;  %v4062_v43 = vld [vmem:[#allocation7 + $0x2c0] sm:$0xf0] }
 0x18e   :  { %v1058_v51 = vpack.c.bf16 %v1057_v50, %v1057_v50  ;;  %v3590_v50 = vld [vmem:[#allocation4 + $0x8] sm:$0xf0]  ;;  %1303 = vmatpush.bf16.msra.mxu3 %v3589_v49  ;;  %v3985_v49 = vor.u32 %v4710_v39, %v3982_v40  ;;  %v4060_v40 = vld [vmem:[#allocation7 + $0x2a8] sm:$0xf] }
 0x18f   :  { %v1051_v52 = vpop.f32.mrf.mxu1  ;;  %1313 = vmatpush.bf16.msra.mxu0 %v3617_v28  ;;  %v3812_v28 = vld [vmem:[#allocation7 + $0xc0] sm:$0xf] }
 0x190   :  { %1132 = vmatmul.bf16.vlgmr.msrb.gmra.mxu2 %v1058_v51  ;;  %1433 = vmatmul.bf16.vlgmr.msra.gmra.mxu1 %v1058_v51  ;;  %v4076_v52 = vld [vmem:[#allocation7 + $0x2d0] sm:$0xf]  ;;  %v3813_v41 = vor.u32 %v4671_v30, %v3812_v28  ;;  %v3892_v28 = vld [vmem:[#allocation7 + $0x158] sm:$0xf] }
 0x191   :  { %v4077_v55 = vor.u32 %v4737_v53, %v4076_v52  ;;  %2073 = vmatpush.bf16.msrb.mxu2 %v4081_v31  ;;  %v4704_v52 = vld [vmem:[#allocation7 + $0x1e4] sm:$0xf]  ;;  %v3958_v53 = vld [vmem:[#allocation7 + $0x1f8] sm:$0xf0] }
 0x192   :  { %v4656_v31 = vld [vmem:[#allocation7 + $0x64] sm:$0xf]  ;;  %v3961_v57 = vor.u32 %v4704_v52, %v3958_v53  ;;  %v4681_v52 = vld [vmem:[#allocation7 + $0x12c] sm:$0xf] }
 0x193   :  { %1314 = vmatpush.bf16.msra.mxu0 %v3609_v36  ;;  %v3980_v36 = vld [vmem:[#allocation7 + $0x210] sm:$0xf]  ;;  %v3870_v53 = vld [vmem:[#allocation7 + $0x140] sm:$0xf0] }
 0x195   :  { %2074 = vmatpush.bf16.msrb.mxu2 %v4057_v18  ;;  %v3765_v18 = vor.u32 %v4659_v26, %v3764_v56  ;;  %v4036_v56 = vld [vmem:[#allocation7 + $0x278] sm:$0xf]  ;;  %v4723_v26 = vld [vmem:[#allocation7 + $0x27c] sm:$0xf] }
 0x197   :  { %1315 = vmatpush.bf16.msra.mxu0 %v3601_v44 }
 0x199   :  { %2075 = vmatpush.bf16.msrb.mxu2 %v4033_v14  ;;  %v4735_v14 = vld [vmem:[#allocation7 + $0x2dc] sm:$0xf] }
 0x19d   :  { %2076 = vmatpush.bf16.msrb.mxu2 %v4009_v34  ;;  %v3894_v34 = vld [vmem:[#allocation7 + $0x170] sm:$0xf0] }
 0x1a0   :  { %1446 = vmatmul.bf16.vlgmr.msra.gmra.mxu2 %v1058_v51  ;;  %v3593_v51 = vor.u32 %v4612_v48, %v3590_v50  ;;  %v3790_v48 = vld [vmem:[#allocation7 + $0xa8] sm:$0xf0]  ;;  %v3956_v50 = vld [vmem:[#allocation7 + $0x1e0] sm:$0xf] }
 0x1a1   :  { %2077 = vmatpush.bf16.msrb.mxu2 %v3985_v49  ;;  %v3868_v49 = vld [vmem:[#allocation7 + $0x128] sm:$0xf] }
 0x1a2   :  { %1316 = vmatpush.bf16.msra.mxu0 %v3593_v51  ;;  %v4707_v51 = vld [vmem:[#allocation7 + $0x1f4] sm:$0xf0] }
 0x1a3   :  { %v3957_v25 = vor.u32 %v4707_v51, %v3956_v50  ;;  %v4684_v51 = vld [vmem:[#allocation7 + $0x13c] sm:$0xf0] }
 0x1a5   :  { %2078 = vmatpush.bf16.msrb.mxu2 %v3961_v57  ;;  %v3873_v57 = vor.u32 %v4681_v52, %v3870_v53  ;;  %v3916_v52 = vld [vmem:[#allocation7 + $0x188] sm:$0xf]  ;;  %v4696_v53 = vld [vmem:[#allocation7 + $0x19c] sm:$0xf0] }
 0x1a6   :  { %2047 = vmatpush.bf16.msrb.mxu0 %v4077_v55  ;;  %v3793_v55 = vor.u32 %v4662_v46, %v3790_v48  ;;  %v3893_v46 = vor.u32 %v4690_v32, %v3892_v28  ;;  %v3897_v48 = vor.u32 %v4687_v33, %v3894_v34  ;;  %v3966_v28 = vld [vmem:[#allocation7 + $0x200] sm:$0xf0]  ;;  %v4666_v32 = vld [vmem:[#allocation7 + $0xac] sm:$0xf0]  ;;  %v4663_v34 = vld [vmem:[#allocation7 + $0x9c] sm:$0xf] }
 0x1aa   :  { %2048 = vmatpush.bf16.msrb.mxu0 %v4053_v60  ;;  %v4701_v60 = vld [vmem:[#allocation7 + $0x1c4] sm:$0xf0] }
 0x20d   :  { %v5228_v59 = vpop.f32.mrf.mxu1 }
 0x213   :  { %v1133_v5 = vpop.f32.mrf.mxu2 }
 0x214   :  { %v1140_v8 = vadd.f32 %v4846_v1, %v1133_v5  ;;  %v4028_v1 = vld [vmem:[#allocation7 + $0x270] sm:$0xf]  ;;  %v3860_v5 = vld [vmem:[#allocation7 + $0x120] sm:$0xf] }
 0x215   :  { %v1436_v12 = vpop.f32.mrf.mxu1  ;;  %v3861_v7 = vor.u32 %v4683_v6, %v3860_v5  ;;  %v4029_v10 = vor.u32 %v4725_v2, %v4028_v1  ;;  %v3933_v1 = vor.u32 %v4701_v60, %v3932_v58  ;;  %v3908_v2 = vld [vmem:[#allocation7 + $0x180] sm:$0xf]  ;;  %v4650_v5 = vld [vmem:[#allocation7 + $0x34] sm:$0xf]  ;;  %v3742_v6 = vld [vmem:[#allocation7 + $0x48] sm:$0xf0] }
 0x216   :  { %v1141_v13 = vmax.f32 %v1140_v8, 0.0  ;;  %v4680_v8 = vld [vmem:[#allocation7 + $0x124] sm:$0xf]  ;;  %v4004_v12 = vld [vmem:[#allocation7 + $0x240] sm:$0xf] }
 0x217   :  { %v3865_v11 = vor.u32 %v4680_v8, %v3862_v9  ;;  %2049 = vmatpush.bf16.msrb.mxu0 %v4029_v10  ;;  %v3937_v8 = vor.u32 %v4698_v61, %v3934_v62  ;;  %v4692_v9 = vld [vmem:[#allocation7 + $0x184] sm:$0xf]  ;;  %v3910_v10 = vld [vmem:[#allocation7 + $0x198] sm:$0xf0]  ;;  %v3844_v58 = vld [vmem:[#allocation7 + $0xf8] sm:$0xf] }
 0x218   :  { %v1142_v19 = vpack.c.bf16 %v1141_v13, %v1141_v13  ;;  %v4719_v13 = vld [vmem:[#allocation7 + $0x254] sm:$0xf0]  ;;  %v3913_v30 = vor.u32 %v4692_v9, %v3910_v10  ;;  %v4678_v60 = vld [vmem:[#allocation7 + $0x10c] sm:$0xf0]  ;;  %v3846_v61 = vld [vmem:[#allocation7 + $0x110] sm:$0xf0] }
 0x219   :  { %2061 = vmatpush.bf16.msrb.mxu1 %v3865_v11  ;;  %v4005_v29 = vor.u32 %v4719_v13, %v4004_v12  ;;  %v4084_v11 = vld [vmem:[#allocation7 + $0x2d8] sm:$0xf]  ;;  %v4738_v13 = vld [vmem:[#allocation7 + $0x2ec] sm:$0xf0]  ;;  %2079 = vmatpush.bf16.msrb.mxu2 %v3937_v8  ;;  %v3822_v8 = vld [vmem:[#allocation7 + $0xe0] sm:$0xf0] }
 0x21a   :  { %3585 = vmatmul.msk.bf16.vlgmr.msrb.gmra.mxu3 %vm1176_vm0, %v1142_v19  ;;  %v4674_v19 = vld [vmem:[#allocation7 + $0xf4] sm:$0xf] }
 0x21b   :  { %v1135_v24 = vpop.f32.mrf.mxu2  ;;  %2034 = vmatpush.bf16.msrb.mxu3 %v3885_v63  ;;  %v3841_v27 = vor.u32 %v4674_v19, %v3838_v22  ;;  %2050 = vmatpush.bf16.msrb.mxu0 %v4005_v29  ;;  %v3769_v63 = vor.u32 %v4656_v31, %v3766_v35  ;;  %v3745_v19 = vor.u32 %v4650_v5, %v3742_v6  ;;  %v4644_v22 = vld [vmem:[#allocation7 + $0x4] sm:$0xf]  ;;  %v4038_v31 = vld [vmem:[#allocation7 + $0x290] sm:$0xf0]  ;;  %v3820_v5 = vld [vmem:[#allocation7 + $0xc8] sm:$0xf] }
 0x21c   :  { %v3837_v24 = vor.u32 %v4677_v16, %v3836_v15  ;;  %v4086_v15 = vld [vmem:[#allocation7 + $0x2f0] sm:$0xf0]  ;;  %v3741_v16 = vor.u32 %v4653_v4, %v3740_v0  ;;  %v3909_v29 = vor.u32 %v4695_v3, %v3908_v2  ;;  %v3869_v35 = vor.u32 %v4684_v51, %v3868_v49  ;;  %v4720_v0 = vld [vmem:[#allocation7 + $0x25c] sm:$0xf0]  ;;  %v4014_v2 = vld [vmem:[#allocation7 + $0x260] sm:$0xf0] }
 0x21d   :  { %2062 = vmatpush.bf16.msrb.mxu1 %v3841_v27  ;;  %v3718_v27 = vld [vmem:[#allocation7 + $0x18] sm:$0xf0]  ;;  %v4089_v39 = vor.u32 %v4735_v14, %v4086_v15  ;;  %2080 = vmatpush.bf16.msrb.mxu2 %v3913_v30  ;;  %v3845_v3 = vor.u32 %v4678_v60, %v3844_v58  ;;  %v4672_v6 = vld [vmem:[#allocation7 + $0xdc] sm:$0xf0]  ;;  %v3990_v14 = vld [vmem:[#allocation7 + $0x230] sm:$0xf0] }
 0x21e   :  { %v3721_v45 = vor.u32 %v4644_v22, %v3718_v27  ;;  %v3821_v15 = vor.u32 %v4672_v6, %v3820_v5  ;;  %v4708_v22 = vld [vmem:[#allocation7 + $0x1fc] sm:$0xf0]  ;;  %v3796_v30 = vld [vmem:[#allocation7 + $0x98] sm:$0xf]  ;;  %v3750_v58 = vld [vmem:[#allocation7 + $0x50] sm:$0xf0] }
 0x21f   :  { %2035 = vmatpush.bf16.msrb.mxu3 %v3861_v7  ;;  %v3797_v33 = vor.u32 %v4666_v32, %v3796_v30  ;;  %v4092_v6 = vld [vmem:[#allocation7 + $0x2e0] sm:$0xf]  ;;  %v3902_v30 = vld [vmem:[#allocation7 + $0x178] sm:$0xf0] }
 0x221   :  { %2063 = vmatpush.bf16.msrb.mxu1 %v3817_v42  ;;  %v4729_v42 = vld [vmem:[#allocation7 + $0x2ac] sm:$0xf]  ;;  %2125 = vmatpush.bf16.msra.mxu2 %v4089_v39  ;;  %v3940_v39 = vld [vmem:[#allocation7 + $0x1b8] sm:$0xf] }
 0x223   :  { %v5233_v37 = vpop.f32.mrf.mxu2  ;;  %2036 = vmatpush.bf16.msrb.mxu3 %v3837_v24 }
 0x225   :  { %2064 = vmatpush.bf16.msrb.mxu1 %v3793_v55  ;;  %v4065_v55 = vor.u32 %v4729_v42, %v4062_v43  ;;  %v3942_v43 = vld [vmem:[#allocation7 + $0x1d0] sm:$0xf0] }
 0x227   :  { %2037 = vmatpush.bf16.msrb.mxu3 %v3813_v41  ;;  %v4732_v41 = vld [vmem:[#allocation7 + $0x2bc] sm:$0xf0]  ;;  %2126 = vmatpush.bf16.msra.mxu2 %v4065_v55  ;;  %v4693_v55 = vld [vmem:[#allocation7 + $0x18c] sm:$0xf] }
 0x229   :  { %2065 = vmatpush.bf16.msrb.mxu1 %v3769_v63  ;;  %v4012_v63 = vld [vmem:[#allocation7 + $0x248] sm:$0xf] }
 0x22a   :  { %v4013_v9 = vor.u32 %v4720_v0, %v4012_v63  ;;  %v3726_v63 = vld [vmem:[#allocation7 + $0x20] sm:$0xf0] }
 0x22b   :  { %v1449_v38 = vpop.f32.mrf.mxu2  ;;  %2038 = vmatpush.bf16.msrb.mxu3 %v3789_v54  ;;  %v4061_v54 = vor.u32 %v4732_v41, %v4060_v40  ;;  %v4702_v40 = vld [vmem:[#allocation7 + $0x1cc] sm:$0xf0]  ;;  %v4699_v41 = vld [vmem:[#allocation7 + $0x1bc] sm:$0xf] }
 0x22c   :  { %v4713_v38 = vld [vmem:[#allocation7 + $0x224] sm:$0xf0]  ;;  %v3941_v42 = vor.u32 %v4702_v40, %v3940_v39  ;;  %v4724_v39 = vld [vmem:[#allocation7 + $0x284] sm:$0xf]  ;;  %v4046_v40 = vld [vmem:[#allocation7 + $0x298] sm:$0xf0] }
 0x22d   :  { %v3981_v44 = vor.u32 %v4713_v38, %v3980_v36  ;;  %v4085_v38 = vor.u32 %v4738_v13, %v4084_v11  ;;  %2066 = vmatpush.bf16.msrb.mxu1 %v3745_v19  ;;  %v3988_v11 = vld [vmem:[#allocation7 + $0x218] sm:$0xf]  ;;  %v4711_v13 = vld [vmem:[#allocation7 + $0x21c] sm:$0xf] }
 0x22f   :  { %2051 = vmatpush.bf16.msrb.mxu0 %v3981_v44  ;;  %2039 = vmatpush.bf16.msrb.mxu3 %v3765_v18  ;;  %v3717_v44 = vor.u32 %v4647_v21, %v3716_v20  ;;  %v4041_v18 = vor.u32 %v4723_v26, %v4038_v31  ;;  %v3993_v20 = vor.u32 %v4711_v13, %v3990_v14  ;;  %v3964_v21 = vld [vmem:[#allocation7 + $0x1e8] sm:$0xf]  ;;  %v3748_v26 = vld [vmem:[#allocation7 + $0x38] sm:$0xf]  ;;  %v4654_v31 = vld [vmem:[#allocation7 + $0x4c] sm:$0xf0] }
 0x230   :  { %v3965_v27 = vor.u32 %v4708_v22, %v3964_v21  ;;  %v4730_v21 = vld [vmem:[#allocation7 + $0x2b4] sm:$0xf]  ;;  %v4070_v22 = vld [vmem:[#allocation7 + $0x2c8] sm:$0xf0] }
 0x231   :  { %2067 = vmatpush.bf16.msrb.mxu1 %v3721_v45  ;;  %2127 = vmatpush.bf16.msra.mxu2 %v4041_v18  ;;  %v3772_v45 = vld [vmem:[#allocation7 + $0x68] sm:$0xf]  ;;  %v4645_v18 = vld [vmem:[#allocation7 + $0xc] sm:$0xf] }
 0x232   :  { %v3729_v0 = vor.u32 %v4645_v18, %v3726_v63 }
 0x233   :  { %2052 = vmatpush.bf16.msrb.mxu0 %v3957_v25  ;;  %2040 = vmatpush.bf16.msrb.mxu3 %v3741_v16  ;;  %v4726_v25 = vld [vmem:[#allocation7 + $0x28c] sm:$0xf0] }
 0x234   :  { %v4037_v62 = vor.u32 %v4726_v25, %v4036_v56  ;;  %v3918_v56 = vld [vmem:[#allocation7 + $0x1a0] sm:$0xf0] }
 0x235   :  { %2112 = vmatpush.bf16.msra.mxu1 %v3897_v48  ;;  %v4657_v48 = vld [vmem:[#allocation7 + $0x6c] sm:$0xf]  ;;  %v3921_v25 = vor.u32 %v4693_v55, %v3918_v56 }
 0x237   :  { %2053 = vmatpush.bf16.msrb.mxu0 %v3933_v1  ;;  %2041 = vmatpush.bf16.msrb.mxu3 %v3717_v44  ;;  %v4717_v1 = vld [vmem:[#allocation7 + $0x24c] sm:$0xf]  ;;  %v3945_v44 = vor.u32 %v4699_v41, %v3942_v43  ;;  %v3876_v43 = vld [vmem:[#allocation7 + $0x130] sm:$0xf] }
 0x238   :  { %v4017_v10 = vor.u32 %v4717_v1, %v4014_v2  ;;  %v1199_v1 = vld [vmem:[%s5325_s11] sm:$0x3] }
 0x239   :  { %2113 = vmatpush.bf16.msra.mxu1 %v3873_v57  ;;  %v3749_v57 = vor.u32 %v4654_v31, %v3748_v26  ;;  %v1324_v2 = vperm.slane %v1199_v1, 1  ;;  %v1323_v5 = vperm.slane %v1199_v1, 0  ;;  %v4679_v26 = vld [vmem:[#allocation7 + $0x114] sm:$0xf0]  ;;  %v4676_v31 = vld [vmem:[#allocation7 + $0x104] sm:$0xf] }
 0x23a   :  { %2128 = vmatpush.bf16.msra.mxu2 %v4017_v10  ;;  %v4094_v10 = vld [vmem:[#allocation7 + $0x2f8] sm:$0xf0]  ;;  %v4673_v1 = vld [vmem:[#allocation7 + $0xe4] sm:$0xf0] }
 0x23b   :  { %2054 = vmatpush.bf16.msrb.mxu0 %v3909_v29 }
 0x23e   :  { %2129 = vmatpush.bf16.msra.mxu2 %v3993_v20  ;;  %v4733_v20 = vld [vmem:[#allocation7 + $0x2c4] sm:$0xf0] }
 0x29d   :  { %v1189_v7 = vpop.f32.mrf.mxu3 }
 0x29e   :  { %v1196_v12 = vadd.f32 %v4847_v17, %v1189_v7  ;;  %v4675_v17 = vld [vmem:[#allocation7 + $0xfc] sm:$0xf]  ;;  %v4669_v7 = vld [vmem:[#allocation7 + $0xcc] sm:$0xf] }
 0x29f   :  { %v3849_v4 = vor.u32 %v4675_v17, %v3846_v61  ;;  %v3825_v16 = vor.u32 %v4669_v7, %v3822_v8  ;;  %v3724_v17 = vld [vmem:[#allocation7 + $0x8] sm:$0xf]  ;;  %v4648_v61 = vld [vmem:[#allocation7 + $0x1c] sm:$0xf0]  ;;  %v4739_v8 = vld [vmem:[#allocation7 + $0x2f4] sm:$0xf0] }
 0x2a0   :  { %v1197_v24 = vmax.f32 %v1196_v12, 0.0  ;;  %v4714_v12 = vld [vmem:[#allocation7 + $0x22c] sm:$0xf0]  ;;  %v4093_v13 = vor.u32 %v4739_v8, %v4092_v6  ;;  %v4706_v8 = vld [vmem:[#allocation7 + $0x1f4] sm:$0xf] }
 0x2a1   :  { %2114 = vmatpush.bf16.msra.mxu1 %v3849_v4  ;;  %v3989_v19 = vor.u32 %v4714_v12, %v3988_v11  ;;  %v3972_v6 = vld [vmem:[#allocation7 + $0x1f0] sm:$0xf] }
 0x2a2   :  { %v1198_v36 = vpack.c.bf16 %v1197_v24, %v1197_v24  ;;  %v4705_v24 = vld [vmem:[#allocation7 + $0x1ec] sm:$0xf] }
 0x2a3   :  { %v3969_v29 = vor.u32 %v4705_v24, %v3966_v28 }
 0x2a4   :  { %1304 = vmatmul.bf16.vlgmr.msra.gmra.mxu3 %v1198_v36  ;;  %1317 = vmatmul.bf16.vlgmr.msra.gmra.mxu0 %v1198_v36  ;;  %v3798_v36 = vld [vmem:[#allocation7 + $0xb0] sm:$0xf0] }
 0x2a5   :  { %v1191_v50 = vpop.f32.mrf.mxu3  ;;  %2099 = vmatpush.bf16.msra.mxu0 %v4085_v38  ;;  %2086 = vmatpush.bf16.msra.mxu3 %v3893_v46  ;;  %v3801_v38 = vor.u32 %v4663_v34, %v3798_v36  ;;  %v4660_v46 = vld [vmem:[#allocation7 + $0x7c] sm:$0xf0]  ;;  %v4727_v36 = vld [vmem:[#allocation7 + $0x294] sm:$0xf0] }
 0x2a6   :  { %2115 = vmatpush.bf16.msra.mxu1 %v3825_v16  ;;  %2130 = vmatpush.bf16.msra.mxu2 %v3969_v29  ;;  %v3773_v49 = vor.u32 %v4660_v46, %v3772_v45  ;;  %v3774_v50 = vld [vmem:[#allocation7 + $0x80] sm:$0xf0]  ;;  %v4044_v34 = vld [vmem:[#allocation7 + $0x280] sm:$0xf]  ;;  %v4682_v45 = vld [vmem:[#allocation7 + $0x134] sm:$0xf] }
 0x2a7   :  { %v3777_v51 = vor.u32 %v4657_v48, %v3774_v50  ;;  %v4688_v29 = vld [vmem:[#allocation7 + $0x164] sm:$0xf]  ;;  %v3878_v46 = vld [vmem:[#allocation7 + $0x148] sm:$0xf0]  ;;  %v4049_v50 = vor.u32 %v4724_v39, %v4046_v40  ;;  %v4697_v39 = vld [vmem:[#allocation7 + $0x1a4] sm:$0xf0] }
 0x2a8   :  { %v3881_v56 = vor.u32 %v4682_v45, %v3878_v46  ;;  %v4694_v40 = vld [vmem:[#allocation7 + $0x194] sm:$0xf] }
 0x2a9   :  { %2100 = vmatpush.bf16.msra.mxu0 %v4061_v54  ;;  %2087 = vmatpush.bf16.msra.mxu3 %v3869_v35  ;;  %v3917_v54 = vor.u32 %v4696_v53, %v3916_v52  ;;  %v4651_v35 = vld [vmem:[#allocation7 + $0x3c] sm:$0xf]  ;;  %v4721_v52 = vld [vmem:[#allocation7 + $0x264] sm:$0xf0]  ;;  %v4718_v53 = vld [vmem:[#allocation7 + $0x254] sm:$0xf] }
 0x2aa   :  { %2116 = vmatpush.bf16.msra.mxu1 %v3801_v38  ;;  %2131 = vmatpush.bf16.msra.mxu2 %v3945_v44  ;;  %v3753_v60 = vor.u32 %v4651_v35, %v3750_v58  ;;  %v4685_v44 = vld [vmem:[#allocation7 + $0x144] sm:$0xf0]  ;;  %v3854_v35 = vld [vmem:[#allocation7 + $0x118] sm:$0xf0]  ;;  %v4830_v46 = vld [vmem:[#allocation9 + $0x2d4] sm:$0xf] }
 0x2ab   :  { %v3877_v55 = vor.u32 %v4685_v44, %v3876_v43  ;;  %v3857_v63 = vor.u32 %v4676_v31, %v3854_v35  ;;  %v4833_v43 = vld [vmem:[#allocation9 + $0x2e4] sm:$0xf0]  ;;  %v4824_v31 = vld [vmem:[#allocation9 + $0x2a4] sm:$0xf] }
 0x2ad   :  { %2101 = vmatpush.bf16.msra.mxu0 %v4037_v62  ;;  %2088 = vmatpush.bf16.msra.mxu3 %v3845_v3  ;;  %v3725_v62 = vor.u32 %v4648_v61, %v3724_v17  ;;  %v4715_v17 = vld [vmem:[#allocation7 + $0x234] sm:$0xf0]  ;;  %v4712_v61 = vld [vmem:[#allocation7 + $0x224] sm:$0xf] }
 0x2ae   :  { %2117 = vmatpush.bf16.msra.mxu1 %v3777_v51  ;;  %2132 = vmatpush.bf16.msra.mxu2 %v3921_v25  ;;  %v4020_v51 = vld [vmem:[#allocation7 + $0x250] sm:$0xf]  ;;  %v3852_v25 = vld [vmem:[#allocation7 + $0x100] sm:$0xf] }
 0x2af   :  { %v3853_v18 = vor.u32 %v4679_v26, %v3852_v25  ;;  %v4436_v25 = vld [vmem:[#allocation9 + $0x2a0] sm:$0xf]  ;;  %v4827_v26 = vld [vmem:[#allocation9 + $0x2b4] sm:$0xf0] }
 0x2b1   :  { %2102 = vmatpush.bf16.msra.mxu0 %v4013_v9  ;;  %2089 = vmatpush.bf16.msra.mxu3 %v3821_v15  ;;  %v4736_v9 = vld [vmem:[#allocation7 + $0x2e4] sm:$0xf]  ;;  %v4068_v15 = vld [vmem:[#allocation7 + $0x2b0] sm:$0xf] }
 0x2b2   :  { %2118 = vmatpush.bf16.msra.mxu1 %v3753_v60  ;;  %v4097_v14 = vor.u32 %v4736_v9, %v4094_v10  ;;  %v4069_v32 = vor.u32 %v4733_v20, %v4068_v15  ;;  %v3996_v60 = vld [vmem:[#allocation7 + $0x220] sm:$0xf]  ;;  %v3974_v9 = vld [vmem:[#allocation7 + $0x208] sm:$0xf0]  ;;  %v3806_v15 = vld [vmem:[#allocation7 + $0xb8] sm:$0xf0] }
 0x2b3   :  { %v3977_v20 = vor.u32 %v4706_v8, %v3974_v9  ;;  %v4818_v8 = vld [vmem:[#allocation9 + $0x274] sm:$0xf]  ;;  %v4414_v9 = vld [vmem:[#allocation9 + $0x288] sm:$0xf0] }
 0x2b5   :  { %2103 = vmatpush.bf16.msra.mxu0 %v3989_v19  ;;  %2090 = vmatpush.bf16.msra.mxu3 %v3797_v33  ;;  %v4073_v33 = vor.u32 %v4730_v21, %v4070_v22  ;;  %v3948_v21 = vld [vmem:[#allocation7 + $0x1c0] sm:$0xf]  ;;  %v4703_v22 = vld [vmem:[#allocation7 + $0x1d4] sm:$0xf0] }
 0x2b6   :  { %2119 = vmatpush.bf16.msra.mxu1 %v3729_v0  ;;  %v3828_v0 = vld [vmem:[#allocation7 + $0xd0] sm:$0xf] }
 0x2b7   :  { %v3829_v10 = vor.u32 %v4673_v1, %v3828_v0  ;;  %v4782_v0 = vld [vmem:[#allocation9 + $0x154] sm:$0xf]  ;;  %v4270_v1 = vld [vmem:[#allocation9 + $0x168] sm:$0xf0] }
 0x2b9   :  { %2104 = vmatpush.bf16.msra.mxu0 %v3965_v27  ;;  %2091 = vmatpush.bf16.msra.mxu3 %v3773_v49  ;;  %v3900_v27 = vld [vmem:[#allocation7 + $0x160] sm:$0xf]  ;;  %v4045_v49 = vor.u32 %v4727_v36, %v4044_v34  ;;  %v3949_v34 = vor.u32 %v4703_v22, %v3948_v21  ;;  %v4815_v22 = vld [vmem:[#allocation9 + $0x254] sm:$0xf0] }
 0x2ba   :  { %v4388_v21 = vld [vmem:[#allocation9 + $0x240] sm:$0xf] }
 0x2bd   :  { %2105 = vmatpush.bf16.msra.mxu0 %v3941_v42  ;;  %2092 = vmatpush.bf16.msra.mxu3 %v3749_v57  ;;  %v3905_v42 = vor.u32 %v4688_v29, %v3902_v30  ;;  %v4021_v57 = vor.u32 %v4721_v52, %v4020_v51  ;;  %v3780_v29 = vld [vmem:[#allocation7 + $0x70] sm:$0xf]  ;;  %v4661_v30 = vld [vmem:[#allocation7 + $0x84] sm:$0xf0]  ;;  %v4652_v51 = vld [vmem:[#allocation7 + $0x44] sm:$0xf] }
 0x2be   :  { %v3781_v44 = vor.u32 %v4661_v30, %v3780_v29  ;;  %v3758_v52 = vld [vmem:[#allocation7 + $0x58] sm:$0xf0]  ;;  %v4773_v29 = vld [vmem:[#allocation9 + $0x104] sm:$0xf0]  ;;  %v4770_v30 = vld [vmem:[#allocation9 + $0xf4] sm:$0xf] }
 0x2c1   :  { %2106 = vmatpush.bf16.msra.mxu0 %v3917_v54  ;;  %2093 = vmatpush.bf16.msra.mxu3 %v3725_v62  ;;  %v4022_v54 = vld [vmem:[#allocation7 + $0x268] sm:$0xf0]  ;;  %v3998_v62 = vld [vmem:[#allocation7 + $0x238] sm:$0xf0] }
 0x2c2   :  { %v4025_v58 = vor.u32 %v4718_v53, %v4022_v54 }
 0x321   :  { %v1318_v3 = vpop.f32.mrf.mxu0 }
 0x322   :  { %v1328_v4 = vadd.f32 %v1324_v2, %v1318_v3  ;;  %v4670_v2 = vld [vmem:[#allocation7 + $0xd4] sm:$0xf]  ;;  %v3830_v3 = vld [vmem:[#allocation7 + $0xe8] sm:$0xf0] }
 0x324   :  { %v1452_v7 = vadd.f32 %v5233_v37, %v1328_v4  ;;  %v4691_v37 = vld [vmem:[#allocation7 + $0x174] sm:$0xf0]  ;;  %v3997_v4 = vor.u32 %v4715_v17, %v3996_v60  ;;  %v3732_v60 = vld [vmem:[#allocation7 + $0x10] sm:$0xf]  ;;  %v4649_v17 = vld [vmem:[#allocation7 + $0x24] sm:$0xf0] }
 0x325   :  { %v3901_v41 = vor.u32 %v4691_v37, %v3900_v27  ;;  %v3950_v27 = vld [vmem:[#allocation7 + $0x1d8] sm:$0xf0] }
 0x326   :  { %v1454_v11 = vmax.f32 %v1452_v7, 0.0  ;;  %v4709_v7 = vld [vmem:[#allocation7 + $0x204] sm:$0xf0] }
 0x327   :  { %v1305_v12 = vpop.f32.mrf.mxu3 }
 0x328   :  { %v5242_v16 = vpack.c.bf16 %v1454_v11, %v1454_v11  ;;  %v1327_v19 = vadd.f32 %v1323_v5, %v1305_v12  ;;  %v4001_v5 = vor.u32 %v4712_v61, %v3998_v62  ;;  %v3833_v11 = vor.u32 %v4670_v2, %v3830_v3  ;;  %v3804_v12 = vld [vmem:[#allocation7 + $0xa0] sm:$0xf]  ;;  %v4646_v61 = vld [vmem:[#allocation7 + $0x14] sm:$0xf]  ;;  %v3734_v62 = vld [vmem:[#allocation7 + $0x28] sm:$0xf0] }
 0x329   :  { %v1320_v24 = vpop.f32.mrf.mxu0  ;;  %v4437_v2 = vor.u32 %v4827_v26, %v4436_v25  ;;  %v4758_v25 = vld [vmem:[#allocation9 + $0x94] sm:$0xf]  ;;  %v4174_v26 = vld [vmem:[#allocation9 + $0xa8] sm:$0xf0] }
 0x32a   :  { %v1451_v28 = vadd.f32 %v5228_v59, %v1327_v19  ;;  %2055 = vmatmul.bf16.vlgmr.msrb.gmra.mxu0 %v5242_v16  ;;  %2081 = vmatmul.bf16.vlgmr.msrb.gmra.mxu2 %v5242_v16  ;;  %v3973_v19 = vor.u32 %v4709_v7, %v3972_v6  ;;  %v4700_v24 = vld [vmem:[#allocation7 + $0x1c4] sm:$0xf]  ;;  %v3737_v6 = vor.u32 %v4646_v61, %v3734_v62  ;;  %v4821_v7 = vld [vmem:[#allocation9 + $0x284] sm:$0xf0] }
 0x32b   :  { %2151 = vmatpush.bf16.msrb.mxu0 %v4093_v13  ;;  %2177 = vmatpush.bf16.msrb.mxu2 %v4097_v14  ;;  %v4667_v13 = vld [vmem:[#allocation7 + $0xb4] sm:$0xf0]  ;;  %v4664_v14 = vld [vmem:[#allocation7 + $0xa4] sm:$0xf]  ;;  %v3953_v36 = vor.u32 %v4700_v24, %v3950_v27  ;;  %v4390_v27 = vld [vmem:[#allocation9 + $0x258] sm:$0xf0]  ;;  %v4177_v62 = vor.u32 %v4758_v25, %v4174_v26 }
 0x32c   :  { %v1453_v38 = vmax.f32 %v1451_v28, 0.0  ;;  %v3805_v28 = vor.u32 %v4667_v13, %v3804_v12  ;;  %v3809_v37 = vor.u32 %v4664_v14, %v3806_v15  ;;  %v4244_v12 = vld [vmem:[#allocation9 + $0x120] sm:$0xf]  ;;  %v4779_v13 = vld [vmem:[#allocation9 + $0x134] sm:$0xf0] }
 0x32d   :  { %v4776_v14 = vld [vmem:[#allocation9 + $0x124] sm:$0xf]  ;;  %v4246_v15 = vld [vmem:[#allocation9 + $0x138] sm:$0xf0] }
 0x32e   :  { %v5247_v59 = vpack.c.bf16 %v1453_v38, %v1453_v38  ;;  %v3924_v38 = vld [vmem:[#allocation7 + $0x190] sm:$0xf]  ;;  %v4812_v24 = vld [vmem:[#allocation9 + $0x244] sm:$0xf] }
 0x32f   :  { %2152 = vmatpush.bf16.msrb.mxu0 %v4069_v32  ;;  %2178 = vmatpush.bf16.msrb.mxu2 %v4073_v33  ;;  %v1307_v48 = vpop.f32.mrf.mxu3  ;;  %v4658_v32 = vld [vmem:[#allocation7 + $0x74] sm:$0xf]  ;;  %v3782_v33 = vld [vmem:[#allocation7 + $0x88] sm:$0xf0]  ;;  %v3925_v53 = vor.u32 %v4697_v39, %v3924_v38  ;;  %v4809_v38 = vld [vmem:[#allocation9 + $0x224] sm:$0xf0] }
 0x330   :  { %2042 = vmatmul.bf16.vlgmr.msrb.gmra.mxu3 %v5247_v59  ;;  %2068 = vmatmul.bf16.vlgmr.msrb.gmra.mxu1 %v5247_v59  ;;  %v3785_v45 = vor.u32 %v4658_v32, %v3782_v33  ;;  %v4462_v48 = vld [vmem:[#allocation9 + $0x2e8] sm:$0xf0]  ;;  %v4389_v33 = vor.u32 %v4815_v22, %v4388_v21  ;;  %v4806_v39 = vld [vmem:[#allocation9 + $0x214] sm:$0xf] }
 0x331   :  { %2138 = vmatpush.bf16.msrb.mxu3 %v3901_v41  ;;  %2164 = vmatpush.bf16.msrb.mxu1 %v3905_v42  ;;  %v3926_v41 = vld [vmem:[#allocation7 + $0x1a8] sm:$0xf0]  ;;  %v4460_v42 = vld [vmem:[#allocation9 + $0x2d0] sm:$0xf] }
 0x332   :  { %v3929_v54 = vor.u32 %v4694_v40, %v3926_v41  ;;  %v4222_v32 = vld [vmem:[#allocation9 + $0x108] sm:$0xf0] }
 0x333   :  { %2153 = vmatpush.bf16.msrb.mxu0 %v4045_v49  ;;  %2179 = vmatpush.bf16.msrb.mxu2 %v4049_v50  ;;  %v3756_v49 = vld [vmem:[#allocation7 + $0x40] sm:$0xf]  ;;  %v4655_v50 = vld [vmem:[#allocation7 + $0x54] sm:$0xf0]  ;;  %v4366_v40 = vld [vmem:[#allocation9 + $0x228] sm:$0xf0] }
 0x334   :  { %v3757_v35 = vor.u32 %v4655_v50, %v3756_v49  ;;  %v4369_v49 = vor.u32 %v4806_v39, %v4366_v40  ;;  %v4340_v50 = vld [vmem:[#allocation9 + $0x1e0] sm:$0xf]  ;;  %v4276_v39 = vld [vmem:[#allocation9 + $0x158] sm:$0xf]  ;;  %v4786_v40 = vld [vmem:[#allocation9 + $0x16c] sm:$0xf0] }
 0x335   :  { %2139 = vmatpush.bf16.msrb.mxu3 %v3877_v55  ;;  %2165 = vmatpush.bf16.msrb.mxu1 %v3881_v56  ;;  %v4461_v55 = vor.u32 %v4833_v43, %v4460_v42  ;;  %v4465_v56 = vor.u32 %v4830_v46, %v4462_v48  ;;  %v4225_v42 = vor.u32 %v4770_v30, %v4222_v32  ;;  %v4196_v43 = vld [vmem:[#allocation9 + $0xc0] sm:$0xf]  ;;  %v4198_v46 = vld [vmem:[#allocation9 + $0xd8] sm:$0xf0]  ;;  %v4446_v32 = vld [vmem:[#allocation9 + $0x2c0] sm:$0xf0] }
 0x337   :  { %2154 = vmatpush.bf16.msrb.mxu0 %v4021_v57  ;;  %2180 = vmatpush.bf16.msrb.mxu2 %v4025_v58  ;;  %v3761_v57 = vor.u32 %v4652_v51, %v3758_v52  ;;  %v4438_v58 = vld [vmem:[#allocation9 + $0x2b8] sm:$0xf0]  ;;  %v4803_v51 = vld [vmem:[#allocation9 + $0x1f4] sm:$0xf0]  ;;  %v4800_v52 = vld [vmem:[#allocation9 + $0x1e4] sm:$0xf] }
 0x338   :  { %v4441_v3 = vor.u32 %v4824_v31, %v4438_v58  ;;  %v4341_v31 = vor.u32 %v4803_v51, %v4340_v50  ;;  %v4797_v58 = vld [vmem:[#allocation9 + $0x1c4] sm:$0xf0]  ;;  %v4277_v50 = vor.u32 %v4786_v40, %v4276_v39  ;;  %v4756_v40 = vld [vmem:[#allocation9 + $0x7c] sm:$0xf0] }
 0x339   :  { %2140 = vmatpush.bf16.msrb.mxu3 %v3853_v18  ;;  %2166 = vmatpush.bf16.msrb.mxu1 %v3857_v63  ;;  %v4268_v18 = vld [vmem:[#allocation9 + $0x150] sm:$0xf]  ;;  %v4785_v63 = vld [vmem:[#allocation9 + $0x164] sm:$0xf0] }
 0x33a   :  { %2107 = vmatmul.bf16.vlgmr.msra.gmra.mxu0 %v5242_v16  ;;  %2133 = vmatmul.bf16.vlgmr.msra.gmra.mxu2 %v5242_v16  ;;  %v4156_v39 = vld [vmem:[#allocation9 + $0x68] sm:$0xf] }
 0x33b   :  { %2155 = vmatpush.bf16.msrb.mxu0 %v3997_v4  ;;  %2181 = vmatpush.bf16.msrb.mxu2 %v4001_v5  ;;  %v4412_v4 = vld [vmem:[#allocation9 + $0x270] sm:$0xf]  ;;  %v3733_v5 = vor.u32 %v4649_v17, %v3732_v60  ;;  %v4794_v60 = vld [vmem:[#allocation9 + $0x1b4] sm:$0xf]  ;;  %v4318_v17 = vld [vmem:[#allocation9 + $0x1c8] sm:$0xf0] }
 0x33d   :  { %2141 = vmatpush.bf16.msrb.mxu3 %v3829_v10  ;;  %2167 = vmatpush.bf16.msrb.mxu1 %v3833_v11  ;;  %v4269_v10 = vor.u32 %v4785_v63, %v4268_v18  ;;  %v4273_v11 = vor.u32 %v4782_v0, %v4270_v1  ;;  %v4148_v18 = vld [vmem:[#allocation9 + $0x60] sm:$0xf]  ;;  %v4755_v63 = vld [vmem:[#allocation9 + $0x74] sm:$0xf0]  ;;  %v4752_v0 = vld [vmem:[#allocation9 + $0x64] sm:$0xf] }
 0x33e   :  { %v4150_v1 = vld [vmem:[#allocation9 + $0x78] sm:$0xf0] }
 0x33f   :  { %2156 = vmatpush.bf16.msrb.mxu0 %v3973_v19  ;;  %2182 = vmatpush.bf16.msrb.mxu2 %v3977_v20  ;;  %v4413_v19 = vor.u32 %v4821_v7, %v4412_v4  ;;  %v4417_v20 = vor.u32 %v4818_v8, %v4414_v9  ;;  %v4292_v4 = vld [vmem:[#allocation9 + $0x180] sm:$0xf]  ;;  %v4294_v7 = vld [vmem:[#allocation9 + $0x198] sm:$0xf0]  ;;  %v4468_v8 = vld [vmem:[#allocation9 + $0x2d8] sm:$0xf] }
 0x340   :  { %2094 = vmatmul.bf16.vlgmr.msra.gmra.mxu3 %v5247_v59  ;;  %2120 = vmatmul.bf16.vlgmr.msra.gmra.mxu1 %v5247_v59  ;;  %v4834_v9 = vld [vmem:[#allocation9 + $0x2ec] sm:$0xf0] }
 0x341   :  { %2142 = vmatpush.bf16.msrb.mxu3 %v3805_v28  ;;  %2168 = vmatpush.bf16.msrb.mxu1 %v3809_v37  ;;  %v4245_v28 = vor.u32 %v4779_v13, %v4244_v12  ;;  %v4220_v37 = vld [vmem:[#allocation9 + $0xf0] sm:$0xf]  ;;  %v4831_v12 = vld [vmem:[#allocation9 + $0x2dc] sm:$0xf]  ;;  %v4470_v13 = vld [vmem:[#allocation9 + $0x2f0] sm:$0xf0] }
 0x342   :  { %v4221_v41 = vor.u32 %v4773_v29, %v4220_v37  ;;  %v4825_v37 = vld [vmem:[#allocation9 + $0x2ac] sm:$0xf] }
 0x343   :  { %2157 = vmatpush.bf16.msrb.mxu0 %v3949_v34  ;;  %2183 = vmatpush.bf16.msrb.mxu2 %v3953_v36  ;;  %v4393_v34 = vor.u32 %v4812_v24, %v4390_v27  ;;  %v4364_v36 = vld [vmem:[#allocation9 + $0x210] sm:$0xf]  ;;  %v4469_v24 = vor.u32 %v4834_v9, %v4468_v8  ;;  %v4473_v27 = vor.u32 %v4831_v12, %v4470_v13  ;;  %v4204_v8 = vld [vmem:[#allocation9 + $0xc8] sm:$0xf]  ;;  %v4768_v9 = vld [vmem:[#allocation9 + $0xdc] sm:$0xf0] }
 0x344   :  { %v4365_v48 = vor.u32 %v4809_v38, %v4364_v36  ;;  %v4740_v36 = vld [vmem:[#allocation9 + $0x4] sm:$0xf]  ;;  %v4102_v38 = vld [vmem:[#allocation9 + $0x18] sm:$0xf0] }
 0x345   :  { %2143 = vmatpush.bf16.msrb.mxu3 %v3781_v44  ;;  %2169 = vmatpush.bf16.msrb.mxu1 %v3785_v45  ;;  %v4767_v44 = vld [vmem:[#allocation9 + $0xd4] sm:$0xf0]  ;;  %v4764_v45 = vld [vmem:[#allocation9 + $0xc4] sm:$0xf] }
 0x347   :  { %2158 = vmatpush.bf16.msrb.mxu0 %v3925_v53  ;;  %2184 = vmatpush.bf16.msrb.mxu2 %v3929_v54  ;;  %v4342_v53 = vld [vmem:[#allocation9 + $0x1f8] sm:$0xf0]  ;;  %v4201_v54 = vor.u32 %v4764_v45, %v4198_v46  ;;  %v4105_v46 = vor.u32 %v4740_v36, %v4102_v38  ;;  %v4326_v38 = vld [vmem:[#allocation9 + $0x1d0] sm:$0xf0] }
 0x348   :  { %v4795_v36 = vld [vmem:[#allocation9 + $0x1bc] sm:$0xf] }
 0x349   :  { %2144 = vmatpush.bf16.msrb.mxu3 %v3757_v35  ;;  %2170 = vmatpush.bf16.msrb.mxu1 %v3761_v57  ;;  %v4345_v35 = vor.u32 %v4800_v52, %v4342_v53  ;;  %v4316_v57 = vld [vmem:[#allocation9 + $0x1b0] sm:$0xf]  ;;  %v4819_v52 = vld [vmem:[#allocation9 + $0x27c] sm:$0xf]  ;;  %v4422_v53 = vld [vmem:[#allocation9 + $0x290] sm:$0xf0] }
 0x34a   :  { %2159 = vmatmul.bf16.vlgmr.msrb.gmra.mxu0 %v5242_v16  ;;  %2185 = vmatmul.bf16.vlgmr.msrb.gmra.mxu2 %v5242_v16  ;;  %v4249_v16 = vor.u32 %v4776_v14, %v4246_v15  ;;  %v4124_v14 = vld [vmem:[#allocation9 + $0x30] sm:$0xf]  ;;  %v4749_v15 = vld [vmem:[#allocation9 + $0x44] sm:$0xf0]  ;;  %v4425_v26 = vor.u32 %v4819_v52, %v4422_v53  ;;  %v4476_v52 = vld [vmem:[#allocation9 + $0x2e0] sm:$0xf] }
 0x34b   :  { %2798 = vmatpush.bf16.msra.mxu0 %v4461_v55  ;;  %2824 = vmatpush.bf16.msra.mxu2 %v4465_v56  ;;  %v4172_v55 = vld [vmem:[#allocation9 + $0x90] sm:$0xf]  ;;  %v4761_v56 = vld [vmem:[#allocation9 + $0xa4] sm:$0xf0]  ;;  %v4125_v29 = vor.u32 %v4749_v15, %v4124_v14  ;;  %v4804_v15 = vld [vmem:[#allocation9 + $0x1fc] sm:$0xf0] }
 0x34c   :  { %v4173_v61 = vor.u32 %v4761_v56, %v4172_v55  ;;  %v4777_v55 = vld [vmem:[#allocation9 + $0x12c] sm:$0xf]  ;;  %v4254_v56 = vld [vmem:[#allocation9 + $0x140] sm:$0xf0]  ;;  %v4348_v14 = vld [vmem:[#allocation9 + $0x1e8] sm:$0xf] }
 0x34d   :  { %2145 = vmatpush.bf16.msrb.mxu3 %v3733_v5  ;;  %2171 = vmatpush.bf16.msrb.mxu1 %v3737_v6  ;;  %v4791_v5 = vld [vmem:[#allocation9 + $0x194] sm:$0xf0]  ;;  %v4788_v6 = vld [vmem:[#allocation9 + $0x184] sm:$0xf] }
 0x34e   :  { %v4293_v21 = vor.u32 %v4791_v5, %v4292_v4  ;;  %v4297_v22 = vor.u32 %v4788_v6, %v4294_v7  ;;  %v4807_v6 = vld [vmem:[#allocation9 + $0x21c] sm:$0xf]  ;;  %v4374_v7 = vld [vmem:[#allocation9 + $0x230] sm:$0xf0]  ;;  %v4835_v53 = vld [vmem:[#allocation9 + $0x2f4] sm:$0xf0] }
 0x34f   :  { %2799 = vmatpush.bf16.msra.mxu0 %v4437_v2  ;;  %2825 = vmatpush.bf16.msra.mxu2 %v4441_v3  ;;  %v4317_v2 = vor.u32 %v4797_v58, %v4316_v57  ;;  %v4321_v3 = vor.u32 %v4794_v60, %v4318_v17  ;;  %v4257_v58 = vor.u32 %v4777_v55, %v4254_v56  ;;  %v4813_v60 = vld [vmem:[#allocation9 + $0x24c] sm:$0xf]  ;;  %v4398_v17 = vld [vmem:[#allocation9 + $0x260] sm:$0xf0]  ;;  %v4132_v55 = vld [vmem:[#allocation9 + $0x38] sm:$0xf] }
 0x350   :  { %2146 = vmatmul.bf16.vlgmr.msrb.gmra.mxu3 %v5247_v59  ;;  %2172 = vmatmul.bf16.vlgmr.msrb.gmra.mxu1 %v5247_v59  ;;  %v4197_v59 = vor.u32 %v4767_v44, %v4196_v43  ;;  %v4449_v44 = vor.u32 %v4825_v37, %v4446_v32  ;;  %v4377_v13 = vor.u32 %v4807_v6, %v4374_v7  ;;  %v4798_v32 = vld [vmem:[#allocation9 + $0x1cc] sm:$0xf0]  ;;  %v4784_v6 = vld [vmem:[#allocation9 + $0x164] sm:$0xf]  ;;  %v4286_v7 = vld [vmem:[#allocation9 + $0x178] sm:$0xf0] }
 0x351   :  { %2785 = vmatpush.bf16.msra.mxu3 %v4269_v10  ;;  %2811 = vmatpush.bf16.msra.mxu1 %v4273_v11  ;;  %v4149_v10 = vor.u32 %v4755_v63, %v4148_v18  ;;  %v4153_v11 = vor.u32 %v4752_v0, %v4150_v1  ;;  %v4771_v18 = vld [vmem:[#allocation9 + $0xfc] sm:$0xf]  ;;  %v4230_v63 = vld [vmem:[#allocation9 + $0x110] sm:$0xf0]  ;;  %v4401_v1 = vor.u32 %v4813_v60, %v4398_v17  ;;  %v4750_v56 = vld [vmem:[#allocation9 + $0x4c] sm:$0xf0] }
 0x352   :  { %v4233_v5 = vor.u32 %v4771_v18, %v4230_v63  ;;  %v4349_v37 = vor.u32 %v4804_v15, %v4348_v14  ;;  %v4452_v60 = vld [vmem:[#allocation9 + $0x2b0] sm:$0xf]  ;;  %v4829_v17 = vld [vmem:[#allocation9 + $0x2c4] sm:$0xf0]  ;;  %v4454_v63 = vld [vmem:[#allocation9 + $0x2c8] sm:$0xf0]  ;;  %v4289_v15 = vor.u32 %v4784_v6, %v4286_v7 }
 0x353   :  { %2800 = vmatpush.bf16.msra.mxu0 %v4413_v19  ;;  %2826 = vmatpush.bf16.msra.mxu2 %v4417_v20  ;;  %v4746_v19 = vld [vmem:[#allocation9 + $0x34] sm:$0xf]  ;;  %v4126_v20 = vld [vmem:[#allocation9 + $0x48] sm:$0xf0] }
 0x354   :  { %v4129_v30 = vor.u32 %v4746_v19, %v4126_v20  ;;  %v4205_v19 = vor.u32 %v4768_v9, %v4204_v8  ;;  %v4453_v8 = vor.u32 %v4829_v17, %v4452_v60  ;;  %v4760_v60 = vld [vmem:[#allocation9 + $0xa4] sm:$0xf]  ;;  %v4190_v17 = vld [vmem:[#allocation9 + $0xb8] sm:$0xf0]  ;;  %v4754_v6 = vld [vmem:[#allocation9 + $0x74] sm:$0xf] }
 0x355   :  { %2786 = vmatpush.bf16.msra.mxu3 %v4245_v28  ;;  %2812 = vmatpush.bf16.msra.mxu1 %v4249_v16  ;;  %v4444_v28 = vld [vmem:[#allocation9 + $0x2a8] sm:$0xf]  ;;  %v4828_v16 = vld [vmem:[#allocation9 + $0x2bc] sm:$0xf0]  ;;  %v4166_v7 = vld [vmem:[#allocation9 + $0x88] sm:$0xf0] }
 0x356   :  { %v4445_v43 = vor.u32 %v4828_v16, %v4444_v28  ;;  %v4759_v28 = vld [vmem:[#allocation9 + $0x9c] sm:$0xf]  ;;  %v4182_v16 = vld [vmem:[#allocation9 + $0xb0] sm:$0xf0] }
 0x357   :  { %2801 = vmatpush.bf16.msra.mxu0 %v4389_v33  ;;  %2827 = vmatpush.bf16.msra.mxu2 %v4393_v34  ;;  %v4100_v33 = vld [vmem:[#allocation9] sm:$0xf]  ;;  %v4743_v34 = vld [vmem:[#allocation9 + $0x14] sm:$0xf0] }
 0x358   :  { %v4101_v45 = vor.u32 %v4743_v34, %v4100_v33  ;;  %v4185_v34 = vor.u32 %v4759_v28, %v4182_v16 }
 0x359   :  { %2787 = vmatpush.bf16.msra.mxu3 %v4221_v41  ;;  %2813 = vmatpush.bf16.msra.mxu1 %v4225_v42  ;;  %v4783_v41 = vld [vmem:[#allocation9 + $0x15c] sm:$0xf]  ;;  %v4278_v42 = vld [vmem:[#allocation9 + $0x170] sm:$0xf0] }
 0x35a   :  { %v4281_v51 = vor.u32 %v4783_v41, %v4278_v42  ;;  %v4753_v41 = vld [vmem:[#allocation9 + $0x6c] sm:$0xf]  ;;  %v4158_v42 = vld [vmem:[#allocation9 + $0x80] sm:$0xf0] }
 0x35b   :  { %2802 = vmatpush.bf16.msra.mxu0 %v4365_v48  ;;  %2828 = vmatpush.bf16.msra.mxu2 %v4369_v49  ;;  %v4420_v48 = vld [vmem:[#allocation9 + $0x278] sm:$0xf]  ;;  %v4822_v49 = vld [vmem:[#allocation9 + $0x28c] sm:$0xf0] }
 0x35c   :  { %v4421_v25 = vor.u32 %v4822_v49, %v4420_v48  ;;  %v4789_v48 = vld [vmem:[#allocation9 + $0x18c] sm:$0xf]  ;;  %v4157_v49 = vor.u32 %v4756_v40, %v4156_v39  ;;  %v4772_v39 = vld [vmem:[#allocation9 + $0x104] sm:$0xf]  ;;  %v4238_v40 = vld [vmem:[#allocation9 + $0x118] sm:$0xf0] }
 0x35d   :  { %2788 = vmatpush.bf16.msra.mxu3 %v4197_v59  ;;  %2814 = vmatpush.bf16.msra.mxu1 %v4201_v54  ;;  %v4252_v59 = vld [vmem:[#allocation9 + $0x128] sm:$0xf]  ;;  %v4780_v54 = vld [vmem:[#allocation9 + $0x13c] sm:$0xf0] }
 0x35e   :  { %v4253_v57 = vor.u32 %v4780_v54, %v4252_v59  ;;  %v4832_v59 = vld [vmem:[#allocation9 + $0x2e4] sm:$0xf]  ;;  %v4478_v54 = vld [vmem:[#allocation9 + $0x2f8] sm:$0xf0] }
 0x35f   :  { %2803 = vmatpush.bf16.msra.mxu0 %v4341_v31  ;;  %2829 = vmatpush.bf16.msra.mxu2 %v4345_v35  ;;  %v4396_v31 = vld [vmem:[#allocation9 + $0x248] sm:$0xf]  ;;  %v4816_v35 = vld [vmem:[#allocation9 + $0x25c] sm:$0xf0] }
 0x360   :  { %v4397_v0 = vor.u32 %v4816_v35, %v4396_v31 }
 0x361   :  { %2789 = vmatpush.bf16.msra.mxu3 %v4173_v61  ;;  %2815 = vmatpush.bf16.msra.mxu1 %v4177_v62  ;;  %v4228_v61 = vld [vmem:[#allocation9 + $0xf8] sm:$0xf]  ;;  %v4774_v62 = vld [vmem:[#allocation9 + $0x10c] sm:$0xf0] }
 0x362   :  { %v4229_v4 = vor.u32 %v4774_v62, %v4228_v61  ;;  %v4826_v61 = vld [vmem:[#allocation9 + $0x2b4] sm:$0xf]  ;;  %v4133_v62 = vor.u32 %v4750_v56, %v4132_v55  ;;  %v4356_v55 = vld [vmem:[#allocation9 + $0x1f0] sm:$0xf]  ;;  %v4805_v56 = vld [vmem:[#allocation9 + $0x204] sm:$0xf0] }
 0x363   :  { %2804 = vmatpush.bf16.msra.mxu0 %v4317_v2  ;;  %2830 = vmatpush.bf16.msra.mxu2 %v4321_v3  ;;  %v4372_v2 = vld [vmem:[#allocation9 + $0x218] sm:$0xf]  ;;  %v4810_v3 = vld [vmem:[#allocation9 + $0x22c] sm:$0xf0]  ;;  %v4457_v9 = vor.u32 %v4826_v61, %v4454_v63  ;;  %v4357_v61 = vor.u32 %v4805_v56, %v4356_v55 }
 0x364   :  { %v4373_v12 = vor.u32 %v4810_v3, %v4372_v2  ;;  %v4741_v2 = vld [vmem:[#allocation9 + $0xc] sm:$0xf]  ;;  %v4110_v3 = vld [vmem:[#allocation9 + $0x20] sm:$0xf0]  ;;  %v4799_v63 = vld [vmem:[#allocation9 + $0x1d4] sm:$0xf0] }
 0x365   :  { %2790 = vmatpush.bf16.msra.mxu3 %v4149_v10  ;;  %2816 = vmatpush.bf16.msra.mxu1 %v4153_v11  ;;  %v4765_v10 = vld [vmem:[#allocation9 + $0xcc] sm:$0xf]  ;;  %v4206_v11 = vld [vmem:[#allocation9 + $0xe0] sm:$0xf0] }
 0x366   :  { %v4209_v20 = vor.u32 %v4765_v10, %v4206_v11  ;;  %v4113_v11 = vor.u32 %v4741_v2, %v4110_v3  ;;  %v4796_v2 = vld [vmem:[#allocation9 + $0x1c4] sm:$0xf]  ;;  %v4334_v3 = vld [vmem:[#allocation9 + $0x1d8] sm:$0xf0] }
 0x367   :  { %2805 = vmatpush.bf16.msra.mxu0 %v4293_v21  ;;  %2831 = vmatpush.bf16.msra.mxu2 %v4297_v22  ;;  %v4801_v21 = vld [vmem:[#allocation9 + $0x1ec] sm:$0xf]  ;;  %v4350_v22 = vld [vmem:[#allocation9 + $0x200] sm:$0xf0] }
 0x369   :  { %2791 = vmatpush.bf16.msra.mxu3 %v4125_v29  ;;  %2817 = vmatpush.bf16.msra.mxu1 %v4129_v30  ;;  %v4353_v29 = vor.u32 %v4801_v21, %v4350_v22  ;;  %v4324_v30 = vld [vmem:[#allocation9 + $0x1b8] sm:$0xf]  ;;  %v4260_v21 = vld [vmem:[#allocation9 + $0x130] sm:$0xf]  ;;  %v4781_v22 = vld [vmem:[#allocation9 + $0x144] sm:$0xf0] }
 0x36a   :  { %2806 = vmatmul.bf16.vlgmr.msra.gmra.mxu0 %v5186_v47  ;;  %2832 = vmatmul.bf16.vlgmr.msra.gmra.mxu2 %v5186_v47 }
 0x36b   :  { %2850 = vmatpush.bf16.msrb.mxu0 %v4469_v24  ;;  %2876 = vmatpush.bf16.msrb.mxu2 %v4473_v27  ;;  %v4180_v24 = vld [vmem:[#allocation9 + $0x98] sm:$0xf]  ;;  %v4762_v27 = vld [vmem:[#allocation9 + $0xac] sm:$0xf0] }
 0x36c   :  { %v4181_v33 = vor.u32 %v4762_v27, %v4180_v24  ;;  %v4778_v24 = vld [vmem:[#allocation9 + $0x134] sm:$0xf]  ;;  %v4262_v27 = vld [vmem:[#allocation9 + $0x148] sm:$0xf0] }
 0x36d   :  { %2792 = vmatpush.bf16.msra.mxu3 %v4101_v45  ;;  %2818 = vmatpush.bf16.msra.mxu1 %v4105_v46  ;;  %v4300_v45 = vld [vmem:[#allocation9 + $0x188] sm:$0xf]  ;;  %v4792_v46 = vld [vmem:[#allocation9 + $0x19c] sm:$0xf0] }
 0x36e   :  { %v4301_v31 = vor.u32 %v4792_v46, %v4300_v45  ;;  %v4241_v46 = vor.u32 %v4772_v39, %v4238_v40 }
 0x36f   :  { %2851 = vmatpush.bf16.msrb.mxu0 %v4445_v43  ;;  %2877 = vmatpush.bf16.msrb.mxu2 %v4449_v44  ;;  %v4325_v43 = vor.u32 %v4798_v32, %v4324_v30  ;;  %v4329_v44 = vor.u32 %v4795_v36, %v4326_v38  ;;  %v4261_v30 = vor.u32 %v4781_v22, %v4260_v21  ;;  %v4236_v36 = vld [vmem:[#allocation9 + $0x100] sm:$0xf]  ;;  %v4775_v38 = vld [vmem:[#allocation9 + $0x114] sm:$0xf0]  ;;  %v4748_v21 = vld [vmem:[#allocation9 + $0x44] sm:$0xf] }
 0x370   :  { %2793 = vmatmul.bf16.vlgmr.msra.gmra.mxu3 %v5180_v23  ;;  %2819 = vmatmul.bf16.vlgmr.msra.gmra.mxu1 %v5180_v23  ;;  %v4265_v32 = vor.u32 %v4778_v24, %v4262_v27  ;;  %v4237_v45 = vor.u32 %v4775_v38, %v4236_v36  ;;  %v4142_v22 = vld [vmem:[#allocation9 + $0x58] sm:$0xf0] }
 0x371   :  { %2837 = vmatpush.bf16.msrb.mxu3 %v4277_v50  ;;  %2863 = vmatpush.bf16.msrb.mxu1 %v4281_v51  ;;  %v4161_v50 = vor.u32 %v4753_v41, %v4158_v42  ;;  %v4302_v51 = vld [vmem:[#allocation9 + $0x1a0] sm:$0xf0] }
 0x372   :  { %v4305_v35 = vor.u32 %v4789_v48, %v4302_v51  ;;  %v4808_v48 = vld [vmem:[#allocation9 + $0x224] sm:$0xf]  ;;  %v4769_v51 = vld [vmem:[#allocation9 + $0xe4] sm:$0xf0] }
 0x373   :  { %2852 = vmatpush.bf16.msrb.mxu0 %v4421_v25  ;;  %2878 = vmatpush.bf16.msrb.mxu2 %v4425_v26  ;;  %v4747_v25 = vld [vmem:[#allocation9 + $0x3c] sm:$0xf]  ;;  %v4134_v26 = vld [vmem:[#allocation9 + $0x50] sm:$0xf0] }
 0x374   :  { %v4137_v18 = vor.u32 %v4747_v25, %v4134_v26 }
 0x375   :  { %2838 = vmatpush.bf16.msrb.mxu3 %v4253_v57  ;;  %2864 = vmatpush.bf16.msrb.mxu1 %v4257_v58  ;;  %v4477_v57 = vor.u32 %v4835_v53, %v4476_v52  ;;  %v4481_v58 = vor.u32 %v4832_v59, %v4478_v54  ;;  %v4766_v52 = vld [vmem:[#allocation9 + $0xd4] sm:$0xf]  ;;  %v4214_v53 = vld [vmem:[#allocation9 + $0xe8] sm:$0xf0] }
 0x376   :  { %v4217_v26 = vor.u32 %v4766_v52, %v4214_v53 }
 0x377   :  { %2853 = vmatpush.bf16.msrb.mxu0 %v4397_v0  ;;  %2879 = vmatpush.bf16.msrb.mxu2 %v4401_v1  ;;  %v4108_v0 = vld [vmem:[#allocation9 + $0x8] sm:$0xf]  ;;  %v4744_v1 = vld [vmem:[#allocation9 + $0x1c] sm:$0xf0] }
 0x378   :  { %v4109_v10 = vor.u32 %v4744_v1, %v4108_v0  ;;  %v4193_v1 = vor.u32 %v4760_v60, %v4190_v17 }
 0x379   :  { %2839 = vmatpush.bf16.msrb.mxu3 %v4229_v4  ;;  %2865 = vmatpush.bf16.msrb.mxu1 %v4233_v5  ;;  %v4284_v4 = vld [vmem:[#allocation9 + $0x160] sm:$0xf]  ;;  %v4787_v5 = vld [vmem:[#allocation9 + $0x174] sm:$0xf0] }
 0x37a   :  { %v4285_v14 = vor.u32 %v4787_v5, %v4284_v4  ;;  %v4164_v4 = vld [vmem:[#allocation9 + $0x70] sm:$0xf]  ;;  %v4757_v5 = vld [vmem:[#allocation9 + $0x84] sm:$0xf0] }
 0x37b   :  { %2854 = vmatpush.bf16.msrb.mxu0 %v4373_v12  ;;  %2880 = vmatpush.bf16.msrb.mxu2 %v4377_v13  ;;  %v4428_v12 = vld [vmem:[#allocation9 + $0x280] sm:$0xf]  ;;  %v4823_v13 = vld [vmem:[#allocation9 + $0x294] sm:$0xf0] }
 0x37c   :  { %v4429_v28 = vor.u32 %v4823_v13, %v4428_v12  ;;  %v4165_v12 = vor.u32 %v4757_v5, %v4164_v4  ;;  %v4169_v13 = vor.u32 %v4754_v6, %v4166_v7 }
 0x37d   :  { %2840 = vmatpush.bf16.msrb.mxu3 %v4205_v19  ;;  %2866 = vmatpush.bf16.msrb.mxu1 %v4209_v20  ;;  %v4820_v19 = vld [vmem:[#allocation9 + $0x284] sm:$0xf]  ;;  %v4430_v20 = vld [vmem:[#allocation9 + $0x298] sm:$0xf0] }
 0x37e   :  { %v4433_v16 = vor.u32 %v4820_v19, %v4430_v20  ;;  %v4140_v19 = vld [vmem:[#allocation9 + $0x40] sm:$0xf]  ;;  %v4751_v20 = vld [vmem:[#allocation9 + $0x54] sm:$0xf0] }
 0x37f   :  { %2855 = vmatpush.bf16.msrb.mxu0 %v4349_v37  ;;  %2881 = vmatpush.bf16.msrb.mxu2 %v4353_v29  ;;  %v4404_v37 = vld [vmem:[#allocation9 + $0x250] sm:$0xf]  ;;  %v4817_v29 = vld [vmem:[#allocation9 + $0x264] sm:$0xf0] }
 0x380   :  { %v4405_v41 = vor.u32 %v4817_v29, %v4404_v37  ;;  %v4116_v37 = vld [vmem:[#allocation9 + $0x10] sm:$0xf]  ;;  %v4745_v29 = vld [vmem:[#allocation9 + $0x24] sm:$0xf0] }
 0x381   :  { %2841 = vmatpush.bf16.msrb.mxu3 %v4181_v33  ;;  %2867 = vmatpush.bf16.msrb.mxu1 %v4185_v34  ;;  %v4814_v33 = vld [vmem:[#allocation9 + $0x254] sm:$0xf]  ;;  %v4406_v34 = vld [vmem:[#allocation9 + $0x268] sm:$0xf0] }
 0x382   :  { %v4409_v42 = vor.u32 %v4814_v33, %v4406_v34  ;;  %v4117_v33 = vor.u32 %v4745_v29, %v4116_v37 }
 0x383   :  { %2856 = vmatpush.bf16.msrb.mxu0 %v4325_v43  ;;  %2882 = vmatpush.bf16.msrb.mxu2 %v4329_v44  ;;  %v4380_v43 = vld [vmem:[#allocation9 + $0x220] sm:$0xf]  ;;  %v4811_v44 = vld [vmem:[#allocation9 + $0x234] sm:$0xf0] }
 0x384   :  { %v4381_v59 = vor.u32 %v4811_v44, %v4380_v43 }
 0x385   :  { %2842 = vmatpush.bf16.msrb.mxu3 %v4157_v49  ;;  %2868 = vmatpush.bf16.msrb.mxu1 %v4161_v50  ;;  %v4382_v49 = vld [vmem:[#allocation9 + $0x238] sm:$0xf0]  ;;  %v4212_v50 = vld [vmem:[#allocation9 + $0xd0] sm:$0xf] }
 0x386   :  { %v4385_v54 = vor.u32 %v4808_v48, %v4382_v49  ;;  %v4213_v25 = vor.u32 %v4769_v51, %v4212_v50 }
 0x387   :  { %2857 = vmatpush.bf16.msrb.mxu0 %v4301_v31  ;;  %2883 = vmatpush.bf16.msrb.mxu2 %v4305_v35  ;;  %v4802_v31 = vld [vmem:[#allocation9 + $0x1f4] sm:$0xf]  ;;  %v4358_v35 = vld [vmem:[#allocation9 + $0x208] sm:$0xf0] }
 0x389   :  { %2843 = vmatpush.bf16.msrb.mxu3 %v4133_v62  ;;  %2869 = vmatpush.bf16.msrb.mxu1 %v4137_v18  ;;  %v4361_v62 = vor.u32 %v4802_v31, %v4358_v35  ;;  %v4332_v18 = vld [vmem:[#allocation9 + $0x1c0] sm:$0xf] }
 0x38a   :  { %2858 = vmatmul.bf16.vlgmr.msrb.gmra.mxu0 %v5186_v47  ;;  %2884 = vmatmul.bf16.vlgmr.msrb.gmra.mxu2 %v5186_v47 }
 0x38b   :  { %2902 = vmatpush.bf16.msra.mxu0 %v4477_v57  ;;  %2928 = vmatpush.bf16.msra.mxu2 %v4481_v58  ;;  %v4188_v57 = vld [vmem:[#allocation9 + $0xa0] sm:$0xf]  ;;  %v4763_v58 = vld [vmem:[#allocation9 + $0xb4] sm:$0xf0] }
 0x38c   :  { %v4189_v0 = vor.u32 %v4763_v58, %v4188_v57 }
 0x38d   :  { %2844 = vmatpush.bf16.msrb.mxu3 %v4109_v10  ;;  %2870 = vmatpush.bf16.msrb.mxu1 %v4113_v11  ;;  %v4308_v10 = vld [vmem:[#allocation9 + $0x190] sm:$0xf]  ;;  %v4793_v11 = vld [vmem:[#allocation9 + $0x1a4] sm:$0xf0] }
 0x38e   :  { %v4309_v24 = vor.u32 %v4793_v11, %v4308_v10 }
 0x38f   :  { %2903 = vmatpush.bf16.msra.mxu0 %v4453_v8  ;;  %2929 = vmatpush.bf16.msra.mxu2 %v4457_v9  ;;  %v4333_v8 = vor.u32 %v4799_v63, %v4332_v18  ;;  %v4337_v9 = vor.u32 %v4796_v2, %v4334_v3 }
 0x390   :  { %2845 = vmatmul.bf16.vlgmr.msrb.gmra.mxu3 %v5180_v23  ;;  %2871 = vmatmul.bf16.vlgmr.msrb.gmra.mxu1 %v5180_v23 }
 0x391   :  { %2889 = vmatpush.bf16.msra.mxu3 %v4285_v14  ;;  %2915 = vmatpush.bf16.msra.mxu1 %v4289_v15  ;;  %v4790_v14 = vld [vmem:[#allocation9 + $0x194] sm:$0xf]  ;;  %v4310_v15 = vld [vmem:[#allocation9 + $0x1a8] sm:$0xf0] }
 0x392   :  { %v4313_v27 = vor.u32 %v4790_v14, %v4310_v15 }
 0x393   :  { %2904 = vmatpush.bf16.msra.mxu0 %v4429_v28  ;;  %2930 = vmatpush.bf16.msra.mxu2 %v4433_v16  ;;  %v4141_v28 = vor.u32 %v4751_v20, %v4140_v19  ;;  %v4145_v16 = vor.u32 %v4748_v21, %v4142_v22 }
 0x395   :  { %2890 = vmatpush.bf16.msra.mxu3 %v4261_v30  ;;  %2916 = vmatpush.bf16.msra.mxu1 %v4265_v32  ;;  %v4742_v30 = vld [vmem:[#allocation9 + $0x14] sm:$0xf]  ;;  %v4118_v32 = vld [vmem:[#allocation9 + $0x28] sm:$0xf0] }
 0x396   :  { %v4121_v34 = vor.u32 %v4742_v30, %v4118_v32 }
 0x397   :  { %2905 = vmatpush.bf16.msra.mxu0 %v4405_v41  ;;  %2931 = vmatpush.bf16.msra.mxu2 %v4409_v42 }
 0x399   :  { %2891 = vmatpush.bf16.msra.mxu3 %v4237_v45  ;;  %2917 = vmatpush.bf16.msra.mxu1 %v4241_v46 }
 0x39b   :  { %2906 = vmatpush.bf16.msra.mxu0 %v4381_v59  ;;  %2932 = vmatpush.bf16.msra.mxu2 %v4385_v54 }
 0x39d   :  { %2892 = vmatpush.bf16.msra.mxu3 %v4213_v25  ;;  %2918 = vmatpush.bf16.msra.mxu1 %v4217_v26 }
 0x39f   :  { %2907 = vmatpush.bf16.msra.mxu0 %v4357_v61  ;;  %2933 = vmatpush.bf16.msra.mxu2 %v4361_v62  ;;  %v5280_v61 = vld [vmem:[%s5328_s14] sm:$0x3f] }
 0x3a0   :  { %v2192_v18 = vperm.slane %v5280_v61, 1  ;;  %v2191_v4 = vperm.slane %v5280_v61, 0 }
 0x3a1   :  { %2893 = vmatpush.bf16.msra.mxu3 %v4189_v0  ;;  %2919 = vmatpush.bf16.msra.mxu1 %v4193_v1 }
 0x3a3   :  { %2908 = vmatpush.bf16.msra.mxu0 %v4333_v8  ;;  %2934 = vmatpush.bf16.msra.mxu2 %v4337_v9 }
 0x3a5   :  { %2894 = vmatpush.bf16.msra.mxu3 %v4165_v12  ;;  %2920 = vmatpush.bf16.msra.mxu1 %v4169_v13 }
 0x3a7   :  { %2909 = vmatpush.bf16.msra.mxu0 %v4309_v24  ;;  %2935 = vmatpush.bf16.msra.mxu2 %v4313_v27  ;;  %v2056_v36 = vpop.f32.mrf.mxu0 }
 0x3a9   :  { %2895 = vmatpush.bf16.msra.mxu3 %v4141_v28  ;;  %2921 = vmatpush.bf16.msra.mxu1 %v4145_v16  ;;  %v2194_v16 = vperm.slane %v5280_v61, 3 }
 0x3aa   :  { %2910 = vmatmul.bf16.vlgmr.msra.gmra.mxu0 %v5186_v47  ;;  %2936 = vmatmul.bf16.vlgmr.msra.gmra.mxu2 %v5186_v47 }
 0x3ad   :  { %2896 = vmatpush.bf16.msra.mxu3 %v4117_v33  ;;  %2922 = vmatpush.bf16.msra.mxu1 %v4121_v34  ;;  %v2069_v38 = vpop.f32.mrf.mxu1  ;;  %v2082_v39 = vpop.f32.mrf.mxu2 }
 0x3ae   :  { %v2083_v40 = vadd.f32 %v2082_v39, %v2069_v38 }
 0x3af   :  { %v2058_v41 = vpop.f32.mrf.mxu0 }
 0x3b0   :  { %2897 = vmatmul.bf16.vlgmr.msra.gmra.mxu3 %v5180_v23  ;;  %2923 = vmatmul.bf16.vlgmr.msra.gmra.mxu1 %v5180_v23  ;;  %v2204_v1 = vadd.f32 %v2192_v18, %v2083_v40 }
 0x3b3   :  { %v2043_v42 = vpop.f32.mrf.mxu3 }
 0x3b4   :  { %v2057_v43 = vadd.f32 %v2056_v36, %v2043_v42 }
 0x3b5   :  { %v2071_v44 = vpop.f32.mrf.mxu1  ;;  %v2084_v45 = vpop.f32.mrf.mxu2 }
 0x3b6   :  { %v2203_v8 = vadd.f32 %v2191_v4, %v2057_v43  ;;  %v2193_v44 = vperm.slane %v5280_v61, 2 }
 0x3b7   :  { %v2108_v46 = vpop.f32.mrf.mxu0 }
 0x3bb   :  { %v2045_v48 = vpop.f32.mrf.mxu3 }
 0x3bd   :  { %v2121_v49 = vpop.f32.mrf.mxu1  ;;  %v2134_v50 = vpop.f32.mrf.mxu2 }
 0x3be   :  { %v2135_v47 = vadd.f32 %v2134_v50, %v2121_v49 }
 0x3bf   :  { %v2110_v51 = vpop.f32.mrf.mxu0 }
 0x3c0   :  { %v2206_v40 = vadd.f32 %v2194_v16, %v2135_v47 }
 0x3c3   :  { %v2095_v52 = vpop.f32.mrf.mxu3 }
 0x3c4   :  { %v5271_v53 = vadd.f32 %v2108_v46, %v2095_v52 }
 0x3c5   :  { %v2123_v59 = vpop.f32.mrf.mxu1  ;;  %v2136_v54 = vpop.f32.mrf.mxu2 }
 0x3c6   :  { %v2205_v47 = vadd.f32 %v2193_v44, %v5271_v53 }
 0x3c7   :  { %v2160_v23 = vpop.f32.mrf.mxu0 }
 0x3cb   :  { %v2097_v55 = vpop.f32.mrf.mxu3 }
 0x3cd   :  { %v2186_v56 = vpop.f32.mrf.mxu2  ;;  %v2173_v25 = vpop.f32.mrf.mxu1 }
 0x3ce   :  { %v5273_v26 = vadd.f32 %v2186_v56, %v2173_v25 }
 0x3cf   :  { %v2162_v31 = vpop.f32.mrf.mxu0 }
 0x3d3   :  { %v2147_v35 = vpop.f32.mrf.mxu3 }
 0x3d4   :  { %v5275_v57 = vadd.f32 %v2160_v23, %v2147_v35 }
 0x3d5   :  { %v2188_v58 = vpop.f32.mrf.mxu2  ;;  %v2175_v60 = vpop.f32.mrf.mxu1 }
 0x3db   :  { %v2149_v17 = vpop.f32.mrf.mxu3 }
 0x3e7   :  { %v2807_v62 = vpop.f32.mrf.mxu0 }
 0x3ed   :  { %v2820_v63 = vpop.f32.mrf.mxu1  ;;  %v2833_v0 = vpop.f32.mrf.mxu2 }
 0x3ee   :  { %v2834_v2 = vadd.f32 %v2833_v0, %v2820_v63 }
 0x3ef   :  { %v2809_v3 = vpop.f32.mrf.mxu0 }
 0x3f0   :  { %v2942_v5 = vadd.f32 %v2834_v2, %v2204_v1 }
 0x3f2   :  { %v4483_v6 = vmul.f32 -1.442695, %v2942_v5 }
 0x3f3   :  { %v2794_v7 = vpop.f32.mrf.mxu3 }
 0x3f4   :  { %4848 = vpow2.f32 %v4483_v6  ;;  %v2808_v9 = vadd.f32 %v2807_v62, %v2794_v7  ;;  %v2196_v7 = vperm.slane %v5280_v61, 5 }
 0x3f5   :  { %v2822_v10 = vpop.f32.mrf.mxu1  ;;  %v2835_v11 = vpop.f32.mrf.mxu2 }
 0x3f6   :  { %v2941_v12 = vadd.f32 %v2808_v9, %v2203_v8 }
 0x3f8   :  { %v4482_v13 = vmul.f32 -1.442695, %v2941_v12 }
 0x3fa   :  { %v4849_v14 = vpop.eup %4848  ;;  %4850 = vpow2.f32 %v4482_v13  ;;  %v2208_v13 = vadd.f32 %v2196_v7, %v5273_v26 }
 0x3fb   :  { %v2966_v15 = vadd.f32 1.0, %v4849_v14  ;;  %v2796_v19 = vpop.f32.mrf.mxu3 }
 0x3fd   :  { %4852 = vrcp.f32 %v2966_v15  ;;  %v2997_v30 = vand.u32 2147483648, %v2966_v15  ;;  %vm2991_vm2 = vweird.f32 %v2966_v15  ;;  %v2995_v33 = vand.u32 2147483647, %v2966_v15 }
 0x3ff   :  { %v2998_v45 = vor.u32 1.1754944e-38, %v2997_v30  ;;  %vm2996_vm4 = vcmp.eq.f32.partialorder %v2995_v33, 8.507059e+37 }
 0x400   :  { %v4851_v20 = vpop.eup %4850 }
 0x401   :  { %v2965_v21 = vadd.f32 1.0, %v4851_v20 }
 0x403   :  { %v4853_v22 = vpop.eup %4852  ;;  %4854 = vrcp.f32 %v2965_v21  ;;  %v2980_v46 = vand.u32 2147483647, %v2965_v21  ;;  %v2982_v48 = vand.u32 2147483648, %v2965_v21  ;;  %vm2976_vm6 = vweird.f32 %v2965_v21 }
 0x404   :  { %v2987_v24 = vmul.f32 %v4853_v22, %v2966_v15  ;;  %vm2992_vm1 = vweird.f32 %v4853_v22 }
 0x405   :  { %vm5285_vm3 = vmor %vm2991_vm2, %vm2992_vm1  ;;  %vm2981_vm8 = vcmp.eq.f32.partialorder %v2980_v46, 8.507059e+37  ;;  %v2983_v23 = vor.u32 1.1754944e-38, %v2982_v48  ;;  %vm3073_vm2 = vcmask 1045508  }
 0x406   :  { %v2988_v28 = vsub.f32 1.0, %v2987_v24 }
 0x407   :  { %v2859_v27 = vpop.f32.mrf.mxu0 }
 0x408   :  { %v2989_v37 = vmul.f32 %v4853_v22, %v2988_v28 }
 0x409   :  { %v4855_v29 = vpop.eup %4854 }
 0x40a   :  { %v2990_v32 = vadd.f32 %v4853_v22, %v2989_v37  ;;  %v2972_v34 = vmul.f32 %v4855_v29, %v2965_v21  ;;  %vm2977_vm5 = vweird.f32 %v4855_v29 }
 0x40b   :  { %vm2978_vm7 = vmor %vm2976_vm6, %vm2977_vm5 }
 0x40c   :  { %v2994_v41 = vsel %vm5285_vm3, %v4853_v22, %v2990_v32  ;;  %v2973_v42 = vsub.f32 1.0, %v2972_v34  ;;  %v2195_v22 = vperm.slane %v5280_v61, 4  ;;  %vm3075_vm3 = vcmask 1043456  }
 0x40d   :  { %v2872_v38 = vpop.f32.mrf.mxu1  ;;  %v2885_v39 = vpop.f32.mrf.mxu2  ;;  %v2999_v52 = vsel %vm2996_vm4, %v2998_v45, %v2994_v41 }
 0x40e   :  { %v2886_v43 = vadd.f32 %v2885_v39, %v2872_v38  ;;  %v2974_v50 = vmul.f32 %v4855_v29, %v2973_v42  ;;  %v3067_v56 = vrot.slane %v2999_v52, 6  ;;  %v2207_v61 = vadd.f32 %v2195_v22, %v5275_v57 }
 0x40f   :  { %v2861_v49 = vpop.f32.mrf.mxu0 }
 0x410   :  { %v2944_v51 = vadd.f32 %v2886_v43, %v2206_v40  ;;  %v2975_v59 = vadd.f32 %v4855_v29, %v2974_v50 }
 0x412   :  { %v4485_v54 = vmul.f32 -1.442695, %v2944_v51  ;;  %v2979_v25 = vsel %vm2978_vm7, %v4855_v29, %v2975_v59 }
 0x413   :  { %v2846_v55 = vpop.f32.mrf.mxu3  ;;  %v2984_v35 = vsel %vm2981_vm8, %v2983_v23, %v2979_v25 }
 0x414   :  { %4856 = vpow2.f32 %v4485_v54  ;;  %v2860_v31 = vadd.f32 %v2859_v27, %v2846_v55  ;;  %v5294_v17 = vsel %vm3071_vm9, %v2984_v35, %v3067_v56 }
 0x415   :  { %v2874_v58 = vpop.f32.mrf.mxu1  ;;  %v2887_v60 = vpop.f32.mrf.mxu2 }
 0x416   :  { %v2943_v62 = vadd.f32 %v2860_v31, %v2205_v47 }
 0x418   :  { %v4484_v18 = vmul.f32 -1.442695, %v2943_v62 }
 0x41a   :  { %v4857_v63 = vpop.eup %4856  ;;  %4858 = vpow2.f32 %v4484_v18 }
 0x41b   :  { %v2968_v53 = vadd.f32 1.0, %v4857_v63  ;;  %v2848_v0 = vpop.f32.mrf.mxu3 }
 0x41d   :  { %4860 = vrcp.f32 %v2968_v53  ;;  %v3027_v14 = vand.u32 2147483648, %v2968_v53  ;;  %vm3021_vm11 = vweird.f32 %v2968_v53  ;;  %v3025_v19 = vand.u32 2147483647, %v2968_v53 }
 0x41f   :  { %v3028_v30 = vor.u32 1.1754944e-38, %v3027_v14  ;;  %vm3026_vm14 = vcmp.eq.f32.partialorder %v3025_v19, 8.507059e+37 }
 0x420   :  { %v4859_v1 = vpop.eup %4858 }
 0x421   :  { %v2967_v2 = vadd.f32 1.0, %v4859_v1 }
 0x423   :  { %v4861_v3 = vpop.eup %4860  ;;  %4862 = vrcp.f32 %v2967_v2  ;;  %v3010_v27 = vand.u32 2147483647, %v2967_v2  ;;  %v3012_v28 = vand.u32 2147483648, %v2967_v2  ;;  %vm3006_vm15 = vweird.f32 %v2967_v2 }
 0x424   :  { %v3017_v4 = vmul.f32 %v4861_v3, %v2968_v53  ;;  %vm3022_vm10 = vweird.f32 %v4861_v3 }
 0x425   :  { %vm5299_vm12 = vmor %vm3021_vm11, %vm3022_vm10  ;;  %v3013_v38 = vor.u32 1.1754944e-38, %v3012_v28  ;;  %vm3011_vm1 = vcmp.eq.f32.partialorder %v3010_v27, 8.507059e+37 }
 0x426   :  { %v3018_v6 = vsub.f32 1.0, %v3017_v4 }
 0x427   :  { %v2911_v5 = vpop.f32.mrf.mxu0 }
 0x428   :  { %v3019_v8 = vmul.f32 %v4861_v3, %v3018_v6 }
 0x429   :  { %v4863_v9 = vpop.eup %4862 }
 0x42a   :  { %v3020_v10 = vadd.f32 %v4861_v3, %v3019_v8  ;;  %v3002_v11 = vmul.f32 %v4863_v9, %v2967_v2  ;;  %vm3007_vm13 = vweird.f32 %v4863_v9 }
 0x42b   :  { %vm3008_vm0 = vmor %vm3006_vm15, %vm3007_vm13 }
 0x42c   :  { %v3003_v20 = vsub.f32 1.0, %v3002_v11  ;;  %v3024_v37 = vsel %vm5299_vm12, %v4861_v3, %v3020_v10 }
 0x42d   :  { %v2924_v12 = vpop.f32.mrf.mxu1  ;;  %v2937_v15 = vpop.f32.mrf.mxu2  ;;  %v3029_v36 = vsel %vm3026_vm14, %v3028_v30, %v3024_v37 }
 0x42e   :  { %v2938_v21 = vadd.f32 %v2937_v15, %v2924_v12  ;;  %v3004_v29 = vmul.f32 %v4863_v9, %v3003_v20  ;;  %v3069_v45 = vrot.slane %v3029_v36, 2 }
 0x42f   :  { %v2913_v16 = vpop.f32.mrf.mxu0 }
 0x430   :  { %v2946_v26 = vadd.f32 %v2938_v21, %v2208_v13  ;;  %v3005_v32 = vadd.f32 %v4863_v9, %v3004_v29 }
 0x432   :  { %v4487_v33 = vmul.f32 -1.442695, %v2946_v26  ;;  %v3009_v40 = vsel %vm3008_vm0, %v4863_v9, %v3005_v32 }
 0x433   :  { %v2898_v34 = vpop.f32.mrf.mxu3  ;;  %v3014_v42 = vsel %vm3011_vm1, %v3013_v38, %v3009_v40 }
 0x434   :  { %v2912_v39 = vadd.f32 %v2911_v5, %v2898_v34  ;;  %4864 = vpow2.f32 %v4487_v33  ;;  %v3068_v46 = vrot.slane %v3014_v42, 4 }
 0x435   :  { %v2926_v41 = vpop.f32.mrf.mxu1  ;;  %v2939_v44 = vpop.f32.mrf.mxu2 }
 0x436   :  { %v2945_v43 = vadd.f32 %v2912_v39, %v2207_v61  ;;  %v3074_v49 = vsel %vm3073_vm2, %v3068_v46, %v3069_v45 }
 0x437   :  { %v3076_v50 = vsel %vm3075_vm3, %v5294_v17, %v3074_v49 }
 0x438   :  { %v4486_v48 = vmul.f32 -1.442695, %v2945_v43  ;;  %3080 = vst [vmem:[%s5336_s25] sm:$0xff] %v3076_v50 }
 0x43a   :  { %4866 = vpow2.f32 %v4486_v48  ;;  %v4865_v57 = vpop.eup %4864 }
 0x43b   :  { %v2900_v51 = vpop.f32.mrf.mxu3  ;;  %v2970_v52 = vadd.f32 1.0, %v4865_v57 }
 0x43d   :  { %4868 = vrcp.f32 %v2970_v52  ;;  %v3057_v31 = vand.u32 2147483648, %v2970_v52  ;;  %v3055_v35 = vand.u32 2147483647, %v2970_v52  ;;  %vm3051_vm5 = vweird.f32 %v2970_v52 }
 0x43f   :  { %v3058_v18 = vor.u32 1.1754944e-38, %v3057_v31  ;;  %vm3056_vm7 = vcmp.eq.f32.partialorder %v3055_v35, 8.507059e+37 }
 0x440   :  { %v4867_v59 = vpop.eup %4866 }
 0x441   :  { %v2969_v54 = vadd.f32 1.0, %v4867_v59 }
 0x443   :  { %4870 = vrcp.f32 %v2969_v54  ;;  %v4869_v47 = vpop.eup %4868  ;;  %v3042_v63 = vand.u32 2147483648, %v2969_v54  ;;  %v3040_v0 = vand.u32 2147483647, %v2969_v54  ;;  %vm3036_vm10 = vweird.f32 %v2969_v54 }
 0x444   :  { %v3047_v23 = vmul.f32 %v4869_v47, %v2970_v52  ;;  %vm3052_vm4 = vweird.f32 %v4869_v47 }
 0x445   :  { %vm3053_vm6 = vmor %vm3051_vm5, %vm3052_vm4  ;;  %v3043_v3 = vor.u32 1.1754944e-38, %v3042_v63  ;;  %vm3041_vm12 = vcmp.eq.f32.partialorder %v3040_v0, 8.507059e+37 }
 0x446   :  { %v3048_v55 = vsub.f32 1.0, %v3047_v23 }
 0x448   :  { %v3049_v25 = vmul.f32 %v4869_v47, %v3048_v55 }
 0x449   :  { %v4871_v56 = vpop.eup %4870 }
 0x44a   :  { %v3032_v58 = vmul.f32 %v4871_v56, %v2969_v54  ;;  %v3050_v60 = vadd.f32 %v4869_v47, %v3049_v25  ;;  %vm3037_vm8 = vweird.f32 %v4871_v56 }
 0x44b   :  { %vm3038_vm11 = vmor %vm3036_vm10, %vm3037_vm8 }
 0x44c   :  { %v3033_v17 = vsub.f32 1.0, %v3032_v58  ;;  %v3054_v62 = vsel %vm3053_vm6, %v4869_v47, %v3050_v60 }
 0x44d   :  { %v3059_v1 = vsel %vm3056_vm7, %v3058_v18, %v3054_v62 }
 0x44e   :  { %v3034_v53 = vmul.f32 %v4871_v56, %v3033_v17  ;;  %v3070_v4 = vrot.slane %v3059_v1, 6 }
 0x450   :  { %v3035_v2 = vadd.f32 %v4871_v56, %v3034_v53 }
 0x452   :  { %v3039_v5 = vsel %vm3038_vm11, %v4871_v56, %v3035_v2 }
 0x453   :  { %v3044_v6 = vsel %vm3041_vm12, %v3043_v3, %v3039_v5 }
 0x454   :  { %v3077_v7 = vsel %vm3071_vm9, %v3044_v6, %v3070_v4 }
 0x455   :  { %3081 = vst [vmem:[%s5336_s25 + $0x8] sm:$0xf] %v3077_v7 }
 0x456   :  { %3086 = vsyncpa [#allocation3], 1 }
 0x457   :  { %3087 = vsyncpa [#allocation5], 1 }
 0x458   :  { %3088 = vsyncpa [#allocation8], 1 }

</bundles_post_ra>
